<compile_context>
chip_gen: v7x
topology: tpu7x:2x2x1
jax: 0.10.0
libtpu: 0.0.40
codegen_flags: <defaults>
</compile_context>

<pallas_src>
import functools

import numpy as np

import jax
import jax.numpy as jnp
from jax import lax
from jax.experimental import pallas as pl
from jax.experimental.pallas import tpu as pltpu


# ------------------------------ kernel -------------------------------------


def _shift_replicate(x, dy, dx, W, left_edge, right_edge):
    """Sample x at spatial offset (dy, dx) with replicate clamping.

    x is (C, H*W): rows = channels, lanes = flattened (y, x) positions.
    Row (dy) shifts move whole W-lane blocks, so top/bottom clamping falls out
    of the slice+concat; column (dx) shifts need an edge-column fix-up.
    """
    if dx == -1:                      # read column c-1  (clamp at c == 0)
        s = jnp.concatenate([x[:, :1], x[:, :-1]], axis=1)
        x = jnp.where(left_edge, x, s)
    elif dx == 1:                     # read column c+1  (clamp at c == W-1)
        s = jnp.concatenate([x[:, 1:], x[:, -1:]], axis=1)
        x = jnp.where(right_edge, x, s)
    if dy == -1:                      # read row y-1     (clamp at y == 0)
        x = jnp.concatenate([x[:, :W], x[:, :-W]], axis=1)
    elif dy == 1:                     # read row y+1     (clamp at y == H-1)
        x = jnp.concatenate([x[:, W:], x[:, -W:]], axis=1)
    return x


def _conv3x3_im2col(x, w_flat, W, left_edge, right_edge):
    """3x3 replicate-padded conv as a single im2col MXU matmul.

    x:      (Cin, H*W)      activations, spatial flattened onto lanes
    w_flat: (Cout, 9*Cin)   K ordered (dy, dx, cin)
    returns (Cout, H*W) f32 (lane-dense)
    """
    taps = []
    for dy in (-1, 0, 1):
        for dx in (-1, 0, 1):
            taps.append(_shift_replicate(x, dy, dx, W, left_edge, right_edge))
    patches = jnp.concatenate(taps, axis=0)            # (9*Cin, H*W)
    # f32 operands are fine at these tiny channel counts; on v6e/v7x cast the
    # operands to bf16 (keep f32 accumulate) once Cin/Cout become realistic.
    return jnp.dot(w_flat, patches, preferred_element_type=jnp.float32)


def _down_block_kernel(x_ref, w1_ref, g1_ref, b1_ref, w2_ref, g2_ref, b2_ref,
                       col_ref, sel_ref, xconv_ref, xdown_ref, *, W, eps):
    """conv -> BN -> ReLU -> conv -> BN -> ReLU -> (identity, 2x2 maxpool).

    Entire batch is resident in VMEM; BatchNorm uses training-mode batch
    statistics (biased variance) computed in-kernel.
    """
    N = x_ref.shape[0]
    HW = x_ref.shape[2]
    inv_count = 1.0 / float(N * HW)

    col = col_ref[...]                        # (1, HW) int32 column index
    left_edge = col == 0
    right_edge = col == (W - 1)

    w1 = w1_ref[...]
    w2 = w2_ref[...]

    # ---- conv1 on every image (results stay resident) ----
    y1 = [_conv3x3_im2col(x_ref[n], w1, W, left_edge, right_edge)
          for n in range(N)]                  # each (Cout, HW)

    # ---- BatchNorm1 (batch stats over N*H*W per channel) + ReLU ----
    mean1 = sum(y.sum(axis=1, keepdims=True) for y in y1) * inv_count
    var1 = sum(((y - mean1) * (y - mean1)).sum(axis=1, keepdims=True)
               for y in y1) * inv_count       # biased, as torch BN train mode
    scale1 = g1_ref[...] * lax.rsqrt(var1 + eps)
    shift1 = b1_ref[...] - mean1 * scale1
    z1 = [jnp.maximum(y * scale1 + shift1, 0.0) for y in y1]

    # ---- conv2 ----
    y2 = [_conv3x3_im2col(z, w2, W, left_edge, right_edge) for z in z1]

    # ---- BatchNorm2 + ReLU + 2x2/stride-2 max pool ----
    mean2 = sum(y.sum(axis=1, keepdims=True) for y in y2) * inv_count
    var2 = sum(((y - mean2) * (y - mean2)).sum(axis=1, keepdims=True)
               for y in y2) * inv_count
    scale2 = g2_ref[...] * lax.rsqrt(var2 + eps)
    shift2 = b2_ref[...] - mean2 * scale2

    sel = sel_ref[...]                        # (HW, Ho*Wo) 0/1 anchor gather
    for n in range(N):
        xc = jnp.maximum(y2[n] * scale2 + shift2, 0.0)      # (Cout, HW)
        xconv_ref[n] = xc
        # fold in the right neighbour, then the row below: every even-row /
        # even-col "anchor" position now holds the max of its 2x2 window
        right = jnp.concatenate([xc[:, 1:], xc[:, -1:]], axis=1)
        a = jnp.maximum(xc, right)
        below = jnp.concatenate([a[:, W:], a[:, -W:]], axis=1)
        b = jnp.maximum(a, below)
        # exact 0/1-selection matmul pulls the anchors out -> (Cout, Ho*Wo)
        xdown_ref[n] = jnp.dot(b, sel, preferred_element_type=jnp.float32)


# ------------------------------ wrapper ------------------------------------


def down_block_v4_forward(x_nchw, params, eps=1e-5):
    """Forward pass of DownBlock_v4. Returns (x_conv, x_down) in NCHW."""
    N, Cin, H, W = x_nchw.shape
    Cout = params["w1"].shape[0]
    assert H % 2 == 0 and W % 2 == 0
    HW = H * W
    Ho, Wo = H // 2, W // 2

    # free (contiguous) reshape: NCHW -> (N, Cin, H*W); spatial goes to lanes
    x_flat = x_nchw.reshape(N, Cin, HW).astype(jnp.float32)

    # conv weights OIHW -> (Cout, 9*Cin), K ordered (dy, dx, cin) to match the
    # kernel's im2col tap order
    w1 = jnp.transpose(params["w1"], (0, 2, 3, 1)).reshape(Cout, 9 * Cin)
    w2 = jnp.transpose(params["w2"], (0, 2, 3, 1)).reshape(Cout, 9 * Cout)
    w1 = w1.astype(jnp.float32)
    w2 = w2.astype(jnp.float32)
    g1 = params["gamma1"].reshape(Cout, 1).astype(jnp.float32)
    b1 = params["beta1"].reshape(Cout, 1).astype(jnp.float32)
    g2 = params["gamma2"].reshape(Cout, 1).astype(jnp.float32)
    b2 = params["beta2"].reshape(Cout, 1).astype(jnp.float32)

    # tiny baked constants: per-flat-position column index, and the 0/1
    # selection matrix that gathers the 2x2-pool window anchors (exact)
    col_ids = jnp.asarray(
        np.tile(np.arange(W, dtype=np.int32), H).reshape(1, HW))
    sel_np = np.zeros((HW, Ho * Wo), np.float32)
    for yo in range(Ho):
        for xo in range(Wo):
            sel_np[(2 * yo) * W + 2 * xo, yo * Wo + xo] = 1.0
    sel = jnp.asarray(sel_np)

    kernel = functools.partial(_down_block_kernel, W=W, eps=eps)
    vmem = pl.BlockSpec(memory_space=pltpu.MemorySpace.VMEM)
    x_conv_flat, x_down_flat = pl.pallas_call(
        kernel,
        out_shape=(jax.ShapeDtypeStruct((N, Cout, HW), jnp.float32),
                   jax.ShapeDtypeStruct((N, Cout, Ho * Wo), jnp.float32)),
        in_specs=[vmem] * 9,
        out_specs=(vmem, vmem),
    )(x_flat, w1, g1, b1, w2, g2, b2, col_ids, sel)

    # free reshapes back to NCHW
    return (x_conv_flat.reshape(N, Cout, H, W),
            x_down_flat.reshape(N, Cout, Ho, Wo))


# TODO(synk): BatchNorm running_mean/running_var buffer updates (a
# training-time side effect) are not modeled; only the forward output is.


# ------------------------------ reference ----------------------------------


def _reference_forward(x, params, eps=1e-5):
    """Plain-JAX reference (same math as the PyTorch module in train mode)."""
    def conv(x, w):
        xp = jnp.pad(x, ((0, 0), (0, 0), (1, 1), (1, 1)), mode="edge")
        return lax.conv_general_dilated(
            xp, w, window_strides=(1, 1), padding="VALID",
            dimension_numbers=("NCHW", "OIHW", "NCHW"),
            precision=lax.Precision.HIGHEST)

    def bn_relu(x, g, b):
        mean = x.mean(axis=(0, 2, 3), keepdims=True)
        var = ((x - mean) ** 2).mean(axis=(0, 2, 3), keepdims=True)
        y = ((x - mean) * lax.rsqrt(var + eps) * g.reshape(1, -1, 1, 1)
             + b.reshape(1, -1, 1, 1))
        return jnp.maximum(y, 0.0)

    y = bn_relu(conv(x, params["w1"]), params["gamma1"], params["beta1"])
    y = bn_relu(conv(y, params["w2"]), params["gamma2"], params["beta2"])
    N, C, H, W = y.shape
    pooled = y.reshape(N, C, H // 2, 2, W // 2, 2).max(axis=(3, 5))
    return y, pooled


# -------------------------------- main --------------------------------------


if __name__ == "__main__":
    in_channels, out_channels = 4, 8
    N, H, W = 2, 16, 16

    key = jax.random.PRNGKey(0)
    kx, kw1, kw2 = jax.random.split(key, 3)

    # deterministic synthetic parameters (shapes per nn.Conv2d / nn.BatchNorm2d)
    bound1 = 1.0 / (in_channels * 9) ** 0.5
    bound2 = 1.0 / (out_channels * 9) ** 0.5
    params = {
        # PyTorch OIHW layout
        "w1": jax.random.uniform(kw1, (out_channels, in_channels, 3, 3),
                                 jnp.float32, -bound1, bound1),
        "gamma1": jnp.ones((out_channels,), jnp.float32),
        "beta1": jnp.zeros((out_channels,), jnp.float32),
        "w2": jax.random.uniform(kw2, (out_channels, out_channels, 3, 3),
                                 jnp.float32, -bound2, bound2),
        "gamma2": jnp.ones((out_channels,), jnp.float32),
        "beta2": jnp.zeros((out_channels,), jnp.float32),
    }

    x = jax.random.normal(kx, (N, in_channels, H, W), jnp.float32)

    x_conv, x_down = jax.jit(down_block_v4_forward)(x, params)
    jax.block_until_ready((x_conv, x_down))

    assert x_conv.shape == (N, out_channels, H, W)
    assert x_down.shape == (N, out_channels, H // 2, W // 2)
    assert bool(jnp.all(jnp.isfinite(x_conv)))
    assert bool(jnp.all(jnp.isfinite(x_down)))

    # correctness check against a plain-JAX reference of the same module
    ref_conv, ref_down = jax.jit(_reference_forward)(x, params)
    err_conv = float(jnp.max(jnp.abs(x_conv - ref_conv)))
    err_down = float(jnp.max(jnp.abs(x_down - ref_down)))
    assert err_conv < 2e-3 and err_down < 2e-3, (err_conv, err_down)

    print("KERNEL_OK")
</pallas_src>

<mosaic_0001>
module attributes {stable_mosaic.version = 11 : i64} {
  func.func @_down_block_kernel(%arg0: memref<2x4x256xf32, #tpu.memory_space<vmem>>, %arg1: memref<8x36xf32, #tpu.memory_space<vmem>>, %arg2: memref<8x1xf32, #tpu.memory_space<vmem>>, %arg3: memref<8x1xf32, #tpu.memory_space<vmem>>, %arg4: memref<8x72xf32, #tpu.memory_space<vmem>>, %arg5: memref<8x1xf32, #tpu.memory_space<vmem>>, %arg6: memref<8x1xf32, #tpu.memory_space<vmem>>, %arg7: memref<1x256xi32, #tpu.memory_space<vmem>>, %arg8: memref<256x64xf32, #tpu.memory_space<vmem>>, %arg9: memref<2x8x256xf32, #tpu.memory_space<vmem>>, %arg10: memref<2x8x64xf32, #tpu.memory_space<vmem>>) attributes {dimension_semantics = [], scalar_prefetch = 0 : i64, scratch_operands = 0 : i64, tpu.core_type = #tpu.core_type<tc>} {
    %c0 = arith.constant 0 : index
    %c0_0 = arith.constant 0 : index
    %0 = vector.load %arg7[%c0, %c0_0] : memref<1x256xi32, #tpu.memory_space<vmem>>, vector<1x256xi32>
    %c0_i32 = arith.constant 0 : i32
    %1 = vector.broadcast %c0_i32 : i32 to vector<1x256xi32>
    %2 = arith.cmpi eq, %0, %1 : vector<1x256xi32>
    %c15_i32 = arith.constant 15 : i32
    %3 = vector.broadcast %c15_i32 : i32 to vector<1x256xi32>
    %4 = arith.cmpi eq, %0, %3 : vector<1x256xi32>
    %c0_1 = arith.constant 0 : index
    %c0_2 = arith.constant 0 : index
    %5 = vector.load %arg1[%c0_1, %c0_2] : memref<8x36xf32, #tpu.memory_space<vmem>>, vector<8x36xf32>
    %c0_3 = arith.constant 0 : index
    %c0_4 = arith.constant 0 : index
    %6 = vector.load %arg4[%c0_3, %c0_4] : memref<8x72xf32, #tpu.memory_space<vmem>>, vector<8x72xf32>
    %c0_5 = arith.constant 0 : index
    %c0_6 = arith.constant 0 : index
    %c0_7 = arith.constant 0 : index
    %7 = vector.load %arg0[%c0_5, %c0_6, %c0_7] : memref<2x4x256xf32, #tpu.memory_space<vmem>>, vector<1x4x256xf32>
    %8 = vector.shape_cast %7 : vector<1x4x256xf32> to vector<4x256xf32>
    %9 = vector.extract_strided_slice %8 {offsets = [0, 0], sizes = [4, 1], strides = [1, 1]} : vector<4x256xf32> to vector<4x1xf32>
    %10 = vector.extract_strided_slice %8 {offsets = [0, 0], sizes = [4, 255], strides = [1, 1]} : vector<4x256xf32> to vector<4x255xf32>
    %11 = tpu.concatenate %9, %10 in 1 : vector<4x1xf32>, vector<4x255xf32> -> vector<4x256xf32>
    %12 = vector.shape_cast %2 : vector<1x256xi1> to vector<1x256xi1>
    %13 = vector.broadcast %12 : vector<1x256xi1> to vector<4x256xi1>
    %14 = arith.select %13, %8, %11 : vector<4x256xi1>, vector<4x256xf32>
    %15 = vector.extract_strided_slice %14 {offsets = [0, 0], sizes = [4, 16], strides = [1, 1]} : vector<4x256xf32> to vector<4x16xf32>
    %16 = vector.extract_strided_slice %14 {offsets = [0, 0], sizes = [4, 240], strides = [1, 1]} : vector<4x256xf32> to vector<4x240xf32>
    %17 = tpu.concatenate %15, %16 in 1 : vector<4x16xf32>, vector<4x240xf32> -> vector<4x256xf32>
    %18 = vector.extract_strided_slice %8 {offsets = [0, 0], sizes = [4, 16], strides = [1, 1]} : vector<4x256xf32> to vector<4x16xf32>
    %19 = vector.extract_strided_slice %8 {offsets = [0, 0], sizes = [4, 240], strides = [1, 1]} : vector<4x256xf32> to vector<4x240xf32>
    %20 = tpu.concatenate %18, %19 in 1 : vector<4x16xf32>, vector<4x240xf32> -> vector<4x256xf32>
    %21 = vector.extract_strided_slice %8 {offsets = [0, 1], sizes = [4, 255], strides = [1, 1]} : vector<4x256xf32> to vector<4x255xf32>
    %22 = vector.extract_strided_slice %8 {offsets = [0, 255], sizes = [4, 1], strides = [1, 1]} : vector<4x256xf32> to vector<4x1xf32>
    %23 = tpu.concatenate %21, %22 in 1 : vector<4x255xf32>, vector<4x1xf32> -> vector<4x256xf32>
    %24 = vector.shape_cast %4 : vector<1x256xi1> to vector<1x256xi1>
    %25 = vector.broadcast %24 : vector<1x256xi1> to vector<4x256xi1>
    %26 = arith.select %25, %8, %23 : vector<4x256xi1>, vector<4x256xf32>
    %27 = vector.extract_strided_slice %26 {offsets = [0, 0], sizes = [4, 16], strides = [1, 1]} : vector<4x256xf32> to vector<4x16xf32>
    %28 = vector.extract_strided_slice %26 {offsets = [0, 0], sizes = [4, 240], strides = [1, 1]} : vector<4x256xf32> to vector<4x240xf32>
    %29 = tpu.concatenate %27, %28 in 1 : vector<4x16xf32>, vector<4x240xf32> -> vector<4x256xf32>
    %30 = vector.extract_strided_slice %8 {offsets = [0, 0], sizes = [4, 1], strides = [1, 1]} : vector<4x256xf32> to vector<4x1xf32>
    %31 = vector.extract_strided_slice %8 {offsets = [0, 0], sizes = [4, 255], strides = [1, 1]} : vector<4x256xf32> to vector<4x255xf32>
    %32 = tpu.concatenate %30, %31 in 1 : vector<4x1xf32>, vector<4x255xf32> -> vector<4x256xf32>
    %33 = vector.shape_cast %2 : vector<1x256xi1> to vector<1x256xi1>
    %34 = vector.broadcast %33 : vector<1x256xi1> to vector<4x256xi1>
    %35 = arith.select %34, %8, %32 : vector<4x256xi1>, vector<4x256xf32>
    %36 = vector.extract_strided_slice %8 {offsets = [0, 1], sizes = [4, 255], strides = [1, 1]} : vector<4x256xf32> to vector<4x255xf32>
    %37 = vector.extract_strided_slice %8 {offsets = [0, 255], sizes = [4, 1], strides = [1, 1]} : vector<4x256xf32> to vector<4x1xf32>
    %38 = tpu.concatenate %36, %37 in 1 : vector<4x255xf32>, vector<4x1xf32> -> vector<4x256xf32>
    %39 = vector.shape_cast %4 : vector<1x256xi1> to vector<1x256xi1>
    %40 = vector.broadcast %39 : vector<1x256xi1> to vector<4x256xi1>
    %41 = arith.select %40, %8, %38 : vector<4x256xi1>, vector<4x256xf32>
    %42 = vector.extract_strided_slice %8 {offsets = [0, 0], sizes = [4, 1], strides = [1, 1]} : vector<4x256xf32> to vector<4x1xf32>
    %43 = vector.extract_strided_slice %8 {offsets = [0, 0], sizes = [4, 255], strides = [1, 1]} : vector<4x256xf32> to vector<4x255xf32>
    %44 = tpu.concatenate %42, %43 in 1 : vector<4x1xf32>, vector<4x255xf32> -> vector<4x256xf32>
    %45 = vector.shape_cast %2 : vector<1x256xi1> to vector<1x256xi1>
    %46 = vector.broadcast %45 : vector<1x256xi1> to vector<4x256xi1>
    %47 = arith.select %46, %8, %44 : vector<4x256xi1>, vector<4x256xf32>
    %48 = vector.extract_strided_slice %47 {offsets = [0, 16], sizes = [4, 240], strides = [1, 1]} : vector<4x256xf32> to vector<4x240xf32>
    %49 = vector.extract_strided_slice %47 {offsets = [0, 240], sizes = [4, 16], strides = [1, 1]} : vector<4x256xf32> to vector<4x16xf32>
    %50 = tpu.concatenate %48, %49 in 1 : vector<4x240xf32>, vector<4x16xf32> -> vector<4x256xf32>
    %51 = vector.extract_strided_slice %8 {offsets = [0, 16], sizes = [4, 240], strides = [1, 1]} : vector<4x256xf32> to vector<4x240xf32>
    %52 = vector.extract_strided_slice %8 {offsets = [0, 240], sizes = [4, 16], strides = [1, 1]} : vector<4x256xf32> to vector<4x16xf32>
    %53 = tpu.concatenate %51, %52 in 1 : vector<4x240xf32>, vector<4x16xf32> -> vector<4x256xf32>
    %54 = vector.extract_strided_slice %8 {offsets = [0, 1], sizes = [4, 255], strides = [1, 1]} : vector<4x256xf32> to vector<4x255xf32>
    %55 = vector.extract_strided_slice %8 {offsets = [0, 255], sizes = [4, 1], strides = [1, 1]} : vector<4x256xf32> to vector<4x1xf32>
    %56 = tpu.concatenate %54, %55 in 1 : vector<4x255xf32>, vector<4x1xf32> -> vector<4x256xf32>
    %57 = vector.shape_cast %4 : vector<1x256xi1> to vector<1x256xi1>
    %58 = vector.broadcast %57 : vector<1x256xi1> to vector<4x256xi1>
    %59 = arith.select %58, %8, %56 : vector<4x256xi1>, vector<4x256xf32>
    %60 = vector.extract_strided_slice %59 {offsets = [0, 16], sizes = [4, 240], strides = [1, 1]} : vector<4x256xf32> to vector<4x240xf32>
    %61 = vector.extract_strided_slice %59 {offsets = [0, 240], sizes = [4, 16], strides = [1, 1]} : vector<4x256xf32> to vector<4x16xf32>
    %62 = tpu.concatenate %60, %61 in 1 : vector<4x240xf32>, vector<4x16xf32> -> vector<4x256xf32>
    %63 = tpu.concatenate %17, %20, %29, %35, %8, %41, %50, %53, %62 in 0 : vector<4x256xf32>, vector<4x256xf32>, vector<4x256xf32>, vector<4x256xf32>, vector<4x256xf32>, vector<4x256xf32>, vector<4x256xf32>, vector<4x256xf32>, vector<4x256xf32> -> vector<36x256xf32>
    %cst = arith.constant dense<0.000000e+00> : vector<8x256xf32>
    %64 = tpu.matmul %5, %63, %cst {dimension_numbers = #tpu.dot_dimension_numbers<[1], [0], [0], [1], [0, 0, 1, 1], [], []>} : vector<8x36xf32>, vector<36x256xf32>, vector<8x256xf32> -> vector<8x256xf32>
    %c1 = arith.constant 1 : index
    %c0_8 = arith.constant 0 : index
    %c0_9 = arith.constant 0 : index
    %65 = vector.load %arg0[%c1, %c0_8, %c0_9] : memref<2x4x256xf32, #tpu.memory_space<vmem>>, vector<1x4x256xf32>
    %66 = vector.shape_cast %65 : vector<1x4x256xf32> to vector<4x256xf32>
    %67 = vector.extract_strided_slice %66 {offsets = [0, 0], sizes = [4, 1], strides = [1, 1]} : vector<4x256xf32> to vector<4x1xf32>
    %68 = vector.extract_strided_slice %66 {offsets = [0, 0], sizes = [4, 255], strides = [1, 1]} : vector<4x256xf32> to vector<4x255xf32>
    %69 = tpu.concatenate %67, %68 in 1 : vector<4x1xf32>, vector<4x255xf32> -> vector<4x256xf32>
    %70 = vector.shape_cast %2 : vector<1x256xi1> to vector<1x256xi1>
    %71 = vector.broadcast %70 : vector<1x256xi1> to vector<4x256xi1>
    %72 = arith.select %71, %66, %69 : vector<4x256xi1>, vector<4x256xf32>
    %73 = vector.extract_strided_slice %72 {offsets = [0, 0], sizes = [4, 16], strides = [1, 1]} : vector<4x256xf32> to vector<4x16xf32>
    %74 = vector.extract_strided_slice %72 {offsets = [0, 0], sizes = [4, 240], strides = [1, 1]} : vector<4x256xf32> to vector<4x240xf32>
    %75 = tpu.concatenate %73, %74 in 1 : vector<4x16xf32>, vector<4x240xf32> -> vector<4x256xf32>
    %76 = vector.extract_strided_slice %66 {offsets = [0, 0], sizes = [4, 16], strides = [1, 1]} : vector<4x256xf32> to vector<4x16xf32>
    %77 = vector.extract_strided_slice %66 {offsets = [0, 0], sizes = [4, 240], strides = [1, 1]} : vector<4x256xf32> to vector<4x240xf32>
    %78 = tpu.concatenate %76, %77 in 1 : vector<4x16xf32>, vector<4x240xf32> -> vector<4x256xf32>
    %79 = vector.extract_strided_slice %66 {offsets = [0, 1], sizes = [4, 255], strides = [1, 1]} : vector<4x256xf32> to vector<4x255xf32>
    %80 = vector.extract_strided_slice %66 {offsets = [0, 255], sizes = [4, 1], strides = [1, 1]} : vector<4x256xf32> to vector<4x1xf32>
    %81 = tpu.concatenate %79, %80 in 1 : vector<4x255xf32>, vector<4x1xf32> -> vector<4x256xf32>
    %82 = vector.shape_cast %4 : vector<1x256xi1> to vector<1x256xi1>
    %83 = vector.broadcast %82 : vector<1x256xi1> to vector<4x256xi1>
    %84 = arith.select %83, %66, %81 : vector<4x256xi1>, vector<4x256xf32>
    %85 = vector.extract_strided_slice %84 {offsets = [0, 0], sizes = [4, 16], strides = [1, 1]} : vector<4x256xf32> to vector<4x16xf32>
    %86 = vector.extract_strided_slice %84 {offsets = [0, 0], sizes = [4, 240], strides = [1, 1]} : vector<4x256xf32> to vector<4x240xf32>
    %87 = tpu.concatenate %85, %86 in 1 : vector<4x16xf32>, vector<4x240xf32> -> vector<4x256xf32>
    %88 = vector.extract_strided_slice %66 {offsets = [0, 0], sizes = [4, 1], strides = [1, 1]} : vector<4x256xf32> to vector<4x1xf32>
    %89 = vector.extract_strided_slice %66 {offsets = [0, 0], sizes = [4, 255], strides = [1, 1]} : vector<4x256xf32> to vector<4x255xf32>
    %90 = tpu.concatenate %88, %89 in 1 : vector<4x1xf32>, vector<4x255xf32> -> vector<4x256xf32>
    %91 = vector.shape_cast %2 : vector<1x256xi1> to vector<1x256xi1>
    %92 = vector.broadcast %91 : vector<1x256xi1> to vector<4x256xi1>
    %93 = arith.select %92, %66, %90 : vector<4x256xi1>, vector<4x256xf32>
    %94 = vector.extract_strided_slice %66 {offsets = [0, 1], sizes = [4, 255], strides = [1, 1]} : vector<4x256xf32> to vector<4x255xf32>
    %95 = vector.extract_strided_slice %66 {offsets = [0, 255], sizes = [4, 1], strides = [1, 1]} : vector<4x256xf32> to vector<4x1xf32>
    %96 = tpu.concatenate %94, %95 in 1 : vector<4x255xf32>, vector<4x1xf32> -> vector<4x256xf32>
    %97 = vector.shape_cast %4 : vector<1x256xi1> to vector<1x256xi1>
    %98 = vector.broadcast %97 : vector<1x256xi1> to vector<4x256xi1>
    %99 = arith.select %98, %66, %96 : vector<4x256xi1>, vector<4x256xf32>
    %100 = vector.extract_strided_slice %66 {offsets = [0, 0], sizes = [4, 1], strides = [1, 1]} : vector<4x256xf32> to vector<4x1xf32>
    %101 = vector.extract_strided_slice %66 {offsets = [0, 0], sizes = [4, 255], strides = [1, 1]} : vector<4x256xf32> to vector<4x255xf32>
    %102 = tpu.concatenate %100, %101 in 1 : vector<4x1xf32>, vector<4x255xf32> -> vector<4x256xf32>
    %103 = vector.shape_cast %2 : vector<1x256xi1> to vector<1x256xi1>
    %104 = vector.broadcast %103 : vector<1x256xi1> to vector<4x256xi1>
    %105 = arith.select %104, %66, %102 : vector<4x256xi1>, vector<4x256xf32>
    %106 = vector.extract_strided_slice %105 {offsets = [0, 16], sizes = [4, 240], strides = [1, 1]} : vector<4x256xf32> to vector<4x240xf32>
    %107 = vector.extract_strided_slice %105 {offsets = [0, 240], sizes = [4, 16], strides = [1, 1]} : vector<4x256xf32> to vector<4x16xf32>
    %108 = tpu.concatenate %106, %107 in 1 : vector<4x240xf32>, vector<4x16xf32> -> vector<4x256xf32>
    %109 = vector.extract_strided_slice %66 {offsets = [0, 16], sizes = [4, 240], strides = [1, 1]} : vector<4x256xf32> to vector<4x240xf32>
    %110 = vector.extract_strided_slice %66 {offsets = [0, 240], sizes = [4, 16], strides = [1, 1]} : vector<4x256xf32> to vector<4x16xf32>
    %111 = tpu.concatenate %109, %110 in 1 : vector<4x240xf32>, vector<4x16xf32> -> vector<4x256xf32>
    %112 = vector.extract_strided_slice %66 {offsets = [0, 1], sizes = [4, 255], strides = [1, 1]} : vector<4x256xf32> to vector<4x255xf32>
    %113 = vector.extract_strided_slice %66 {offsets = [0, 255], sizes = [4, 1], strides = [1, 1]} : vector<4x256xf32> to vector<4x1xf32>
    %114 = tpu.concatenate %112, %113 in 1 : vector<4x255xf32>, vector<4x1xf32> -> vector<4x256xf32>
    %115 = vector.shape_cast %4 : vector<1x256xi1> to vector<1x256xi1>
    %116 = vector.broadcast %115 : vector<1x256xi1> to vector<4x256xi1>
    %117 = arith.select %116, %66, %114 : vector<4x256xi1>, vector<4x256xf32>
    %118 = vector.extract_strided_slice %117 {offsets = [0, 16], sizes = [4, 240], strides = [1, 1]} : vector<4x256xf32> to vector<4x240xf32>
    %119 = vector.extract_strided_slice %117 {offsets = [0, 240], sizes = [4, 16], strides = [1, 1]} : vector<4x256xf32> to vector<4x16xf32>
    %120 = tpu.concatenate %118, %119 in 1 : vector<4x240xf32>, vector<4x16xf32> -> vector<4x256xf32>
    %121 = tpu.concatenate %75, %78, %87, %93, %66, %99, %108, %111, %120 in 0 : vector<4x256xf32>, vector<4x256xf32>, vector<4x256xf32>, vector<4x256xf32>, vector<4x256xf32>, vector<4x256xf32>, vector<4x256xf32>, vector<4x256xf32>, vector<4x256xf32> -> vector<36x256xf32>
    %cst_10 = arith.constant dense<0.000000e+00> : vector<8x256xf32>
    %122 = tpu.matmul %5, %121, %cst_10 {dimension_numbers = #tpu.dot_dimension_numbers<[1], [0], [0], [1], [0, 0, 1, 1], [], []>} : vector<8x36xf32>, vector<36x256xf32>, vector<8x256xf32> -> vector<8x256xf32>
    %cst_11 = arith.constant dense<0.000000e+00> : vector<8xf32>
    %123 = vector.multi_reduction <add>, %64, %cst_11 [1] : vector<8x256xf32> to vector<8xf32>
    %124 = vector.shape_cast %123 : vector<8xf32> to vector<8x1xf32>
    %cst_12 = arith.constant 0.000000e+00 : f32
    %125 = vector.broadcast %cst_12 : f32 to vector<8x1xf32>
    %126 = arith.addf %125, %124 : vector<8x1xf32>
    %cst_13 = arith.constant dense<0.000000e+00> : vector<8xf32>
    %127 = vector.multi_reduction <add>, %122, %cst_13 [1] : vector<8x256xf32> to vector<8xf32>
    %128 = vector.shape_cast %127 : vector<8xf32> to vector<8x1xf32>
    %129 = arith.addf %126, %128 : vector<8x1xf32>
    %cst_14 = arith.constant 0.001953125 : f32
    %130 = vector.broadcast %cst_14 : f32 to vector<8x1xf32>
    %131 = arith.mulf %129, %130 : vector<8x1xf32>
    %132 = vector.broadcast %131 : vector<8x1xf32> to vector<8x256xf32>
    %133 = arith.subf %64, %132 : vector<8x256xf32>
    %134 = vector.broadcast %131 : vector<8x1xf32> to vector<8x256xf32>
    %135 = arith.subf %64, %134 : vector<8x256xf32>
    %136 = arith.mulf %133, %135 : vector<8x256xf32>
    %cst_15 = arith.constant dense<0.000000e+00> : vector<8xf32>
    %137 = vector.multi_reduction <add>, %136, %cst_15 [1] : vector<8x256xf32> to vector<8xf32>
    %138 = vector.shape_cast %137 : vector<8xf32> to vector<8x1xf32>
    %cst_16 = arith.constant 0.000000e+00 : f32
    %139 = vector.broadcast %cst_16 : f32 to vector<8x1xf32>
    %140 = arith.addf %139, %138 : vector<8x1xf32>
    %141 = vector.broadcast %131 : vector<8x1xf32> to vector<8x256xf32>
    %142 = arith.subf %122, %141 : vector<8x256xf32>
    %143 = vector.broadcast %131 : vector<8x1xf32> to vector<8x256xf32>
    %144 = arith.subf %122, %143 : vector<8x256xf32>
    %145 = arith.mulf %142, %144 : vector<8x256xf32>
    %cst_17 = arith.constant dense<0.000000e+00> : vector<8xf32>
    %146 = vector.multi_reduction <add>, %145, %cst_17 [1] : vector<8x256xf32> to vector<8xf32>
    %147 = vector.shape_cast %146 : vector<8xf32> to vector<8x1xf32>
    %148 = arith.addf %140, %147 : vector<8x1xf32>
    %cst_18 = arith.constant 0.001953125 : f32
    %149 = vector.broadcast %cst_18 : f32 to vector<8x1xf32>
    %150 = arith.mulf %148, %149 : vector<8x1xf32>
    %c0_19 = arith.constant 0 : index
    %c0_20 = arith.constant 0 : index
    %151 = vector.load %arg2[%c0_19, %c0_20] : memref<8x1xf32, #tpu.memory_space<vmem>>, vector<8x1xf32>
    %cst_21 = arith.constant 9.99999974E-6 : f32
    %152 = vector.broadcast %cst_21 : f32 to vector<8x1xf32>
    %153 = arith.addf %150, %152 : vector<8x1xf32>
    %154 = math.rsqrt %153 : vector<8x1xf32>
    %155 = arith.mulf %151, %154 : vector<8x1xf32>
    %c0_22 = arith.constant 0 : index
    %c0_23 = arith.constant 0 : index
    %156 = vector.load %arg3[%c0_22, %c0_23] : memref<8x1xf32, #tpu.memory_space<vmem>>, vector<8x1xf32>
    %157 = arith.mulf %131, %155 : vector<8x1xf32>
    %158 = arith.subf %156, %157 : vector<8x1xf32>
    %159 = vector.broadcast %155 : vector<8x1xf32> to vector<8x256xf32>
    %160 = arith.mulf %64, %159 : vector<8x256xf32>
    %161 = vector.broadcast %158 : vector<8x1xf32> to vector<8x256xf32>
    %162 = arith.addf %160, %161 : vector<8x256xf32>
    %cst_24 = arith.constant 0.000000e+00 : f32
    %163 = vector.broadcast %cst_24 : f32 to vector<8x256xf32>
    %164 = arith.maximumf %162, %163 : vector<8x256xf32>
    %165 = vector.broadcast %155 : vector<8x1xf32> to vector<8x256xf32>
    %166 = arith.mulf %122, %165 : vector<8x256xf32>
    %167 = vector.broadcast %158 : vector<8x1xf32> to vector<8x256xf32>
    %168 = arith.addf %166, %167 : vector<8x256xf32>
    %cst_25 = arith.constant 0.000000e+00 : f32
    %169 = vector.broadcast %cst_25 : f32 to vector<8x256xf32>
    %170 = arith.maximumf %168, %169 : vector<8x256xf32>
    %171 = vector.extract_strided_slice %164 {offsets = [0, 0], sizes = [8, 1], strides = [1, 1]} : vector<8x256xf32> to vector<8x1xf32>
    %172 = vector.extract_strided_slice %164 {offsets = [0, 0], sizes = [8, 255], strides = [1, 1]} : vector<8x256xf32> to vector<8x255xf32>
    %173 = tpu.concatenate %171, %172 in 1 : vector<8x1xf32>, vector<8x255xf32> -> vector<8x256xf32>
    %174 = vector.shape_cast %2 : vector<1x256xi1> to vector<1x256xi1>
    %175 = vector.broadcast %174 : vector<1x256xi1> to vector<8x256xi1>
    %176 = arith.select %175, %164, %173 : vector<8x256xi1>, vector<8x256xf32>
    %177 = vector.extract_strided_slice %176 {offsets = [0, 0], sizes = [8, 16], strides = [1, 1]} : vector<8x256xf32> to vector<8x16xf32>
    %178 = vector.extract_strided_slice %176 {offsets = [0, 0], sizes = [8, 240], strides = [1, 1]} : vector<8x256xf32> to vector<8x240xf32>
    %179 = tpu.concatenate %177, %178 in 1 : vector<8x16xf32>, vector<8x240xf32> -> vector<8x256xf32>
    %180 = vector.extract_strided_slice %164 {offsets = [0, 0], sizes = [8, 16], strides = [1, 1]} : vector<8x256xf32> to vector<8x16xf32>
    %181 = vector.extract_strided_slice %164 {offsets = [0, 0], sizes = [8, 240], strides = [1, 1]} : vector<8x256xf32> to vector<8x240xf32>
    %182 = tpu.concatenate %180, %181 in 1 : vector<8x16xf32>, vector<8x240xf32> -> vector<8x256xf32>
    %183 = vector.extract_strided_slice %164 {offsets = [0, 1], sizes = [8, 255], strides = [1, 1]} : vector<8x256xf32> to vector<8x255xf32>
    %184 = vector.extract_strided_slice %164 {offsets = [0, 255], sizes = [8, 1], strides = [1, 1]} : vector<8x256xf32> to vector<8x1xf32>
    %185 = tpu.concatenate %183, %184 in 1 : vector<8x255xf32>, vector<8x1xf32> -> vector<8x256xf32>
    %186 = vector.shape_cast %4 : vector<1x256xi1> to vector<1x256xi1>
    %187 = vector.broadcast %186 : vector<1x256xi1> to vector<8x256xi1>
    %188 = arith.select %187, %164, %185 : vector<8x256xi1>, vector<8x256xf32>
    %189 = vector.extract_strided_slice %188 {offsets = [0, 0], sizes = [8, 16], strides = [1, 1]} : vector<8x256xf32> to vector<8x16xf32>
    %190 = vector.extract_strided_slice %188 {offsets = [0, 0], sizes = [8, 240], strides = [1, 1]} : vector<8x256xf32> to vector<8x240xf32>
    %191 = tpu.concatenate %189, %190 in 1 : vector<8x16xf32>, vector<8x240xf32> -> vector<8x256xf32>
    %192 = vector.extract_strided_slice %164 {offsets = [0, 0], sizes = [8, 1], strides = [1, 1]} : vector<8x256xf32> to vector<8x1xf32>
    %193 = vector.extract_strided_slice %164 {offsets = [0, 0], sizes = [8, 255], strides = [1, 1]} : vector<8x256xf32> to vector<8x255xf32>
    %194 = tpu.concatenate %192, %193 in 1 : vector<8x1xf32>, vector<8x255xf32> -> vector<8x256xf32>
    %195 = vector.shape_cast %2 : vector<1x256xi1> to vector<1x256xi1>
    %196 = vector.broadcast %195 : vector<1x256xi1> to vector<8x256xi1>
    %197 = arith.select %196, %164, %194 : vector<8x256xi1>, vector<8x256xf32>
    %198 = vector.extract_strided_slice %164 {offsets = [0, 1], sizes = [8, 255], strides = [1, 1]} : vector<8x256xf32> to vector<8x255xf32>
    %199 = vector.extract_strided_slice %164 {offsets = [0, 255], sizes = [8, 1], strides = [1, 1]} : vector<8x256xf32> to vector<8x1xf32>
    %200 = tpu.concatenate %198, %199 in 1 : vector<8x255xf32>, vector<8x1xf32> -> vector<8x256xf32>
    %201 = vector.shape_cast %4 : vector<1x256xi1> to vector<1x256xi1>
    %202 = vector.broadcast %201 : vector<1x256xi1> to vector<8x256xi1>
    %203 = arith.select %202, %164, %200 : vector<8x256xi1>, vector<8x256xf32>
    %204 = vector.extract_strided_slice %164 {offsets = [0, 0], sizes = [8, 1], strides = [1, 1]} : vector<8x256xf32> to vector<8x1xf32>
    %205 = vector.extract_strided_slice %164 {offsets = [0, 0], sizes = [8, 255], strides = [1, 1]} : vector<8x256xf32> to vector<8x255xf32>
    %206 = tpu.concatenate %204, %205 in 1 : vector<8x1xf32>, vector<8x255xf32> -> vector<8x256xf32>
    %207 = vector.shape_cast %2 : vector<1x256xi1> to vector<1x256xi1>
    %208 = vector.broadcast %207 : vector<1x256xi1> to vector<8x256xi1>
    %209 = arith.select %208, %164, %206 : vector<8x256xi1>, vector<8x256xf32>
    %210 = vector.extract_strided_slice %209 {offsets = [0, 16], sizes = [8, 240], strides = [1, 1]} : vector<8x256xf32> to vector<8x240xf32>
    %211 = vector.extract_strided_slice %209 {offsets = [0, 240], sizes = [8, 16], strides = [1, 1]} : vector<8x256xf32> to vector<8x16xf32>
    %212 = tpu.concatenate %210, %211 in 1 : vector<8x240xf32>, vector<8x16xf32> -> vector<8x256xf32>
    %213 = vector.extract_strided_slice %164 {offsets = [0, 16], sizes = [8, 240], strides = [1, 1]} : vector<8x256xf32> to vector<8x240xf32>
    %214 = vector.extract_strided_slice %164 {offsets = [0, 240], sizes = [8, 16], strides = [1, 1]} : vector<8x256xf32> to vector<8x16xf32>
    %215 = tpu.concatenate %213, %214 in 1 : vector<8x240xf32>, vector<8x16xf32> -> vector<8x256xf32>
    %216 = vector.extract_strided_slice %164 {offsets = [0, 1], sizes = [8, 255], strides = [1, 1]} : vector<8x256xf32> to vector<8x255xf32>
    %217 = vector.extract_strided_slice %164 {offsets = [0, 255], sizes = [8, 1], strides = [1, 1]} : vector<8x256xf32> to vector<8x1xf32>
    %218 = tpu.concatenate %216, %217 in 1 : vector<8x255xf32>, vector<8x1xf32> -> vector<8x256xf32>
    %219 = vector.shape_cast %4 : vector<1x256xi1> to vector<1x256xi1>
    %220 = vector.broadcast %219 : vector<1x256xi1> to vector<8x256xi1>
    %221 = arith.select %220, %164, %218 : vector<8x256xi1>, vector<8x256xf32>
    %222 = vector.extract_strided_slice %221 {offsets = [0, 16], sizes = [8, 240], strides = [1, 1]} : vector<8x256xf32> to vector<8x240xf32>
    %223 = vector.extract_strided_slice %221 {offsets = [0, 240], sizes = [8, 16], strides = [1, 1]} : vector<8x256xf32> to vector<8x16xf32>
    %224 = tpu.concatenate %222, %223 in 1 : vector<8x240xf32>, vector<8x16xf32> -> vector<8x256xf32>
    %225 = tpu.concatenate %179, %182, %191, %197, %164, %203, %212, %215, %224 in 0 : vector<8x256xf32>, vector<8x256xf32>, vector<8x256xf32>, vector<8x256xf32>, vector<8x256xf32>, vector<8x256xf32>, vector<8x256xf32>, vector<8x256xf32>, vector<8x256xf32> -> vector<72x256xf32>
    %cst_26 = arith.constant dense<0.000000e+00> : vector<8x256xf32>
    %226 = tpu.matmul %6, %225, %cst_26 {dimension_numbers = #tpu.dot_dimension_numbers<[1], [0], [0], [1], [0, 0, 1, 1], [], []>} : vector<8x72xf32>, vector<72x256xf32>, vector<8x256xf32> -> vector<8x256xf32>
    %227 = vector.extract_strided_slice %170 {offsets = [0, 0], sizes = [8, 1], strides = [1, 1]} : vector<8x256xf32> to vector<8x1xf32>
    %228 = vector.extract_strided_slice %170 {offsets = [0, 0], sizes = [8, 255], strides = [1, 1]} : vector<8x256xf32> to vector<8x255xf32>
    %229 = tpu.concatenate %227, %228 in 1 : vector<8x1xf32>, vector<8x255xf32> -> vector<8x256xf32>
    %230 = vector.shape_cast %2 : vector<1x256xi1> to vector<1x256xi1>
    %231 = vector.broadcast %230 : vector<1x256xi1> to vector<8x256xi1>
    %232 = arith.select %231, %170, %229 : vector<8x256xi1>, vector<8x256xf32>
    %233 = vector.extract_strided_slice %232 {offsets = [0, 0], sizes = [8, 16], strides = [1, 1]} : vector<8x256xf32> to vector<8x16xf32>
    %234 = vector.extract_strided_slice %232 {offsets = [0, 0], sizes = [8, 240], strides = [1, 1]} : vector<8x256xf32> to vector<8x240xf32>
    %235 = tpu.concatenate %233, %234 in 1 : vector<8x16xf32>, vector<8x240xf32> -> vector<8x256xf32>
    %236 = vector.extract_strided_slice %170 {offsets = [0, 0], sizes = [8, 16], strides = [1, 1]} : vector<8x256xf32> to vector<8x16xf32>
    %237 = vector.extract_strided_slice %170 {offsets = [0, 0], sizes = [8, 240], strides = [1, 1]} : vector<8x256xf32> to vector<8x240xf32>
    %238 = tpu.concatenate %236, %237 in 1 : vector<8x16xf32>, vector<8x240xf32> -> vector<8x256xf32>
    %239 = vector.extract_strided_slice %170 {offsets = [0, 1], sizes = [8, 255], strides = [1, 1]} : vector<8x256xf32> to vector<8x255xf32>
    %240 = vector.extract_strided_slice %170 {offsets = [0, 255], sizes = [8, 1], strides = [1, 1]} : vector<8x256xf32> to vector<8x1xf32>
    %241 = tpu.concatenate %239, %240 in 1 : vector<8x255xf32>, vector<8x1xf32> -> vector<8x256xf32>
    %242 = vector.shape_cast %4 : vector<1x256xi1> to vector<1x256xi1>
    %243 = vector.broadcast %242 : vector<1x256xi1> to vector<8x256xi1>
    %244 = arith.select %243, %170, %241 : vector<8x256xi1>, vector<8x256xf32>
    %245 = vector.extract_strided_slice %244 {offsets = [0, 0], sizes = [8, 16], strides = [1, 1]} : vector<8x256xf32> to vector<8x16xf32>
    %246 = vector.extract_strided_slice %244 {offsets = [0, 0], sizes = [8, 240], strides = [1, 1]} : vector<8x256xf32> to vector<8x240xf32>
    %247 = tpu.concatenate %245, %246 in 1 : vector<8x16xf32>, vector<8x240xf32> -> vector<8x256xf32>
    %248 = vector.extract_strided_slice %170 {offsets = [0, 0], sizes = [8, 1], strides = [1, 1]} : vector<8x256xf32> to vector<8x1xf32>
    %249 = vector.extract_strided_slice %170 {offsets = [0, 0], sizes = [8, 255], strides = [1, 1]} : vector<8x256xf32> to vector<8x255xf32>
    %250 = tpu.concatenate %248, %249 in 1 : vector<8x1xf32>, vector<8x255xf32> -> vector<8x256xf32>
    %251 = vector.shape_cast %2 : vector<1x256xi1> to vector<1x256xi1>
    %252 = vector.broadcast %251 : vector<1x256xi1> to vector<8x256xi1>
    %253 = arith.select %252, %170, %250 : vector<8x256xi1>, vector<8x256xf32>
    %254 = vector.extract_strided_slice %170 {offsets = [0, 1], sizes = [8, 255], strides = [1, 1]} : vector<8x256xf32> to vector<8x255xf32>
    %255 = vector.extract_strided_slice %170 {offsets = [0, 255], sizes = [8, 1], strides = [1, 1]} : vector<8x256xf32> to vector<8x1xf32>
    %256 = tpu.concatenate %254, %255 in 1 : vector<8x255xf32>, vector<8x1xf32> -> vector<8x256xf32>
    %257 = vector.shape_cast %4 : vector<1x256xi1> to vector<1x256xi1>
    %258 = vector.broadcast %257 : vector<1x256xi1> to vector<8x256xi1>
    %259 = arith.select %258, %170, %256 : vector<8x256xi1>, vector<8x256xf32>
    %260 = vector.extract_strided_slice %170 {offsets = [0, 0], sizes = [8, 1], strides = [1, 1]} : vector<8x256xf32> to vector<8x1xf32>
    %261 = vector.extract_strided_slice %170 {offsets = [0, 0], sizes = [8, 255], strides = [1, 1]} : vector<8x256xf32> to vector<8x255xf32>
    %262 = tpu.concatenate %260, %261 in 1 : vector<8x1xf32>, vector<8x255xf32> -> vector<8x256xf32>
    %263 = vector.shape_cast %2 : vector<1x256xi1> to vector<1x256xi1>
    %264 = vector.broadcast %263 : vector<1x256xi1> to vector<8x256xi1>
    %265 = arith.select %264, %170, %262 : vector<8x256xi1>, vector<8x256xf32>
    %266 = vector.extract_strided_slice %265 {offsets = [0, 16], sizes = [8, 240], strides = [1, 1]} : vector<8x256xf32> to vector<8x240xf32>
    %267 = vector.extract_strided_slice %265 {offsets = [0, 240], sizes = [8, 16], strides = [1, 1]} : vector<8x256xf32> to vector<8x16xf32>
    %268 = tpu.concatenate %266, %267 in 1 : vector<8x240xf32>, vector<8x16xf32> -> vector<8x256xf32>
    %269 = vector.extract_strided_slice %170 {offsets = [0, 16], sizes = [8, 240], strides = [1, 1]} : vector<8x256xf32> to vector<8x240xf32>
    %270 = vector.extract_strided_slice %170 {offsets = [0, 240], sizes = [8, 16], strides = [1, 1]} : vector<8x256xf32> to vector<8x16xf32>
    %271 = tpu.concatenate %269, %270 in 1 : vector<8x240xf32>, vector<8x16xf32> -> vector<8x256xf32>
    %272 = vector.extract_strided_slice %170 {offsets = [0, 1], sizes = [8, 255], strides = [1, 1]} : vector<8x256xf32> to vector<8x255xf32>
    %273 = vector.extract_strided_slice %170 {offsets = [0, 255], sizes = [8, 1], strides = [1, 1]} : vector<8x256xf32> to vector<8x1xf32>
    %274 = tpu.concatenate %272, %273 in 1 : vector<8x255xf32>, vector<8x1xf32> -> vector<8x256xf32>
    %275 = vector.shape_cast %4 : vector<1x256xi1> to vector<1x256xi1>
    %276 = vector.broadcast %275 : vector<1x256xi1> to vector<8x256xi1>
    %277 = arith.select %276, %170, %274 : vector<8x256xi1>, vector<8x256xf32>
    %278 = vector.extract_strided_slice %277 {offsets = [0, 16], sizes = [8, 240], strides = [1, 1]} : vector<8x256xf32> to vector<8x240xf32>
    %279 = vector.extract_strided_slice %277 {offsets = [0, 240], sizes = [8, 16], strides = [1, 1]} : vector<8x256xf32> to vector<8x16xf32>
    %280 = tpu.concatenate %278, %279 in 1 : vector<8x240xf32>, vector<8x16xf32> -> vector<8x256xf32>
    %281 = tpu.concatenate %235, %238, %247, %253, %170, %259, %268, %271, %280 in 0 : vector<8x256xf32>, vector<8x256xf32>, vector<8x256xf32>, vector<8x256xf32>, vector<8x256xf32>, vector<8x256xf32>, vector<8x256xf32>, vector<8x256xf32>, vector<8x256xf32> -> vector<72x256xf32>
    %cst_27 = arith.constant dense<0.000000e+00> : vector<8x256xf32>
    %282 = tpu.matmul %6, %281, %cst_27 {dimension_numbers = #tpu.dot_dimension_numbers<[1], [0], [0], [1], [0, 0, 1, 1], [], []>} : vector<8x72xf32>, vector<72x256xf32>, vector<8x256xf32> -> vector<8x256xf32>
    %cst_28 = arith.constant dense<0.000000e+00> : vector<8xf32>
    %283 = vector.multi_reduction <add>, %226, %cst_28 [1] : vector<8x256xf32> to vector<8xf32>
    %284 = vector.shape_cast %283 : vector<8xf32> to vector<8x1xf32>
    %cst_29 = arith.constant 0.000000e+00 : f32
    %285 = vector.broadcast %cst_29 : f32 to vector<8x1xf32>
    %286 = arith.addf %285, %284 : vector<8x1xf32>
    %cst_30 = arith.constant dense<0.000000e+00> : vector<8xf32>
    %287 = vector.multi_reduction <add>, %282, %cst_30 [1] : vector<8x256xf32> to vector<8xf32>
    %288 = vector.shape_cast %287 : vector<8xf32> to vector<8x1xf32>
    %289 = arith.addf %286, %288 : vector<8x1xf32>
    %cst_31 = arith.constant 0.001953125 : f32
    %290 = vector.broadcast %cst_31 : f32 to vector<8x1xf32>
    %291 = arith.mulf %289, %290 : vector<8x1xf32>
    %292 = vector.broadcast %291 : vector<8x1xf32> to vector<8x256xf32>
    %293 = arith.subf %226, %292 : vector<8x256xf32>
    %294 = vector.broadcast %291 : vector<8x1xf32> to vector<8x256xf32>
    %295 = arith.subf %226, %294 : vector<8x256xf32>
    %296 = arith.mulf %293, %295 : vector<8x256xf32>
    %cst_32 = arith.constant dense<0.000000e+00> : vector<8xf32>
    %297 = vector.multi_reduction <add>, %296, %cst_32 [1] : vector<8x256xf32> to vector<8xf32>
    %298 = vector.shape_cast %297 : vector<8xf32> to vector<8x1xf32>
    %cst_33 = arith.constant 0.000000e+00 : f32
    %299 = vector.broadcast %cst_33 : f32 to vector<8x1xf32>
    %300 = arith.addf %299, %298 : vector<8x1xf32>
    %301 = vector.broadcast %291 : vector<8x1xf32> to vector<8x256xf32>
    %302 = arith.subf %282, %301 : vector<8x256xf32>
    %303 = vector.broadcast %291 : vector<8x1xf32> to vector<8x256xf32>
    %304 = arith.subf %282, %303 : vector<8x256xf32>
    %305 = arith.mulf %302, %304 : vector<8x256xf32>
    %cst_34 = arith.constant dense<0.000000e+00> : vector<8xf32>
    %306 = vector.multi_reduction <add>, %305, %cst_34 [1] : vector<8x256xf32> to vector<8xf32>
    %307 = vector.shape_cast %306 : vector<8xf32> to vector<8x1xf32>
    %308 = arith.addf %300, %307 : vector<8x1xf32>
    %cst_35 = arith.constant 0.001953125 : f32
    %309 = vector.broadcast %cst_35 : f32 to vector<8x1xf32>
    %310 = arith.mulf %308, %309 : vector<8x1xf32>
    %c0_36 = arith.constant 0 : index
    %c0_37 = arith.constant 0 : index
    %311 = vector.load %arg5[%c0_36, %c0_37] : memref<8x1xf32, #tpu.memory_space<vmem>>, vector<8x1xf32>
    %cst_38 = arith.constant 9.99999974E-6 : f32
    %312 = vector.broadcast %cst_38 : f32 to vector<8x1xf32>
    %313 = arith.addf %310, %312 : vector<8x1xf32>
    %314 = math.rsqrt %313 : vector<8x1xf32>
    %315 = arith.mulf %311, %314 : vector<8x1xf32>
    %c0_39 = arith.constant 0 : index
    %c0_40 = arith.constant 0 : index
    %316 = vector.load %arg6[%c0_39, %c0_40] : memref<8x1xf32, #tpu.memory_space<vmem>>, vector<8x1xf32>
    %317 = arith.mulf %291, %315 : vector<8x1xf32>
    %318 = arith.subf %316, %317 : vector<8x1xf32>
    %c0_41 = arith.constant 0 : index
    %c0_42 = arith.constant 0 : index
    %319 = vector.load %arg8[%c0_41, %c0_42] : memref<256x64xf32, #tpu.memory_space<vmem>>, vector<256x64xf32>
    %320 = vector.broadcast %315 : vector<8x1xf32> to vector<8x256xf32>
    %321 = arith.mulf %226, %320 : vector<8x256xf32>
    %322 = vector.broadcast %318 : vector<8x1xf32> to vector<8x256xf32>
    %323 = arith.addf %321, %322 : vector<8x256xf32>
    %cst_43 = arith.constant 0.000000e+00 : f32
    %324 = vector.broadcast %cst_43 : f32 to vector<8x256xf32>
    %325 = arith.maximumf %323, %324 : vector<8x256xf32>
    %c0_44 = arith.constant 0 : index
    %c0_45 = arith.constant 0 : index
    %c0_46 = arith.constant 0 : index
    %326 = vector.load %arg9[%c0_44, %c0_45, %c0_46] : memref<2x8x256xf32, #tpu.memory_space<vmem>>, vector<1x8x256xf32>
    %327 = vector.shape_cast %326 : vector<1x8x256xf32> to vector<8x256xf32>
    %328 = vector.shape_cast %325 : vector<8x256xf32> to vector<1x8x256xf32>
    tpu.vector_store %arg9[%c0_44, %c0_45, %c0_46], %328 {strides = array<i32>} : memref<2x8x256xf32, #tpu.memory_space<vmem>>, vector<1x8x256xf32>,
    %329 = vector.extract_strided_slice %325 {offsets = [0, 1], sizes = [8, 255], strides = [1, 1]} : vector<8x256xf32> to vector<8x255xf32>
    %330 = vector.extract_strided_slice %325 {offsets = [0, 255], sizes = [8, 1], strides = [1, 1]} : vector<8x256xf32> to vector<8x1xf32>
    %331 = tpu.concatenate %329, %330 in 1 : vector<8x255xf32>, vector<8x1xf32> -> vector<8x256xf32>
    %332 = arith.maximumf %325, %331 : vector<8x256xf32>
    %333 = vector.extract_strided_slice %332 {offsets = [0, 16], sizes = [8, 240], strides = [1, 1]} : vector<8x256xf32> to vector<8x240xf32>
    %334 = vector.extract_strided_slice %332 {offsets = [0, 240], sizes = [8, 16], strides = [1, 1]} : vector<8x256xf32> to vector<8x16xf32>
    %335 = tpu.concatenate %333, %334 in 1 : vector<8x240xf32>, vector<8x16xf32> -> vector<8x256xf32>
    %336 = arith.maximumf %332, %335 : vector<8x256xf32>
    %cst_47 = arith.constant dense<0.000000e+00> : vector<8x64xf32>
    %337 = tpu.matmul %336, %319, %cst_47 {dimension_numbers = #tpu.dot_dimension_numbers<[1], [0], [0], [1], [0, 0, 1, 1], [], []>} : vector<8x256xf32>, vector<256x64xf32>, vector<8x64xf32> -> vector<8x64xf32>
    %c0_48 = arith.constant 0 : index
    %c0_49 = arith.constant 0 : index
    %c0_50 = arith.constant 0 : index
    %338 = vector.load %arg10[%c0_48, %c0_49, %c0_50] : memref<2x8x64xf32, #tpu.memory_space<vmem>>, vector<1x8x64xf32>
    %339 = vector.shape_cast %338 : vector<1x8x64xf32> to vector<8x64xf32>
    %340 = vector.shape_cast %337 : vector<8x64xf32> to vector<1x8x64xf32>
    tpu.vector_store %arg10[%c0_48, %c0_49, %c0_50], %340 {strides = array<i32>} : memref<2x8x64xf32, #tpu.memory_space<vmem>>, vector<1x8x64xf32>,
    %341 = vector.broadcast %315 : vector<8x1xf32> to vector<8x256xf32>
    %342 = arith.mulf %282, %341 : vector<8x256xf32>
    %343 = vector.broadcast %318 : vector<8x1xf32> to vector<8x256xf32>
    %344 = arith.addf %342, %343 : vector<8x256xf32>
    %cst_51 = arith.constant 0.000000e+00 : f32
    %345 = vector.broadcast %cst_51 : f32 to vector<8x256xf32>
    %346 = arith.maximumf %344, %345 : vector<8x256xf32>
    %c1_52 = arith.constant 1 : index
    %c0_53 = arith.constant 0 : index
    %c0_54 = arith.constant 0 : index
    %347 = vector.load %arg9[%c1_52, %c0_53, %c0_54] : memref<2x8x256xf32, #tpu.memory_space<vmem>>, vector<1x8x256xf32>
    %348 = vector.shape_cast %347 : vector<1x8x256xf32> to vector<8x256xf32>
    %349 = vector.shape_cast %346 : vector<8x256xf32> to vector<1x8x256xf32>
    tpu.vector_store %arg9[%c1_52, %c0_53, %c0_54], %349 {strides = array<i32>} : memref<2x8x256xf32, #tpu.memory_space<vmem>>, vector<1x8x256xf32>,
    %350 = vector.extract_strided_slice %346 {offsets = [0, 1], sizes = [8, 255], strides = [1, 1]} : vector<8x256xf32> to vector<8x255xf32>
    %351 = vector.extract_strided_slice %346 {offsets = [0, 255], sizes = [8, 1], strides = [1, 1]} : vector<8x256xf32> to vector<8x1xf32>
    %352 = tpu.concatenate %350, %351 in 1 : vector<8x255xf32>, vector<8x1xf32> -> vector<8x256xf32>
    %353 = arith.maximumf %346, %352 : vector<8x256xf32>
    %354 = vector.extract_strided_slice %353 {offsets = [0, 16], sizes = [8, 240], strides = [1, 1]} : vector<8x256xf32> to vector<8x240xf32>
    %355 = vector.extract_strided_slice %353 {offsets = [0, 240], sizes = [8, 16], strides = [1, 1]} : vector<8x256xf32> to vector<8x16xf32>
    %356 = tpu.concatenate %354, %355 in 1 : vector<8x240xf32>, vector<8x16xf32> -> vector<8x256xf32>
    %357 = arith.maximumf %353, %356 : vector<8x256xf32>
    %cst_55 = arith.constant dense<0.000000e+00> : vector<8x64xf32>
    %358 = tpu.matmul %357, %319, %cst_55 {dimension_numbers = #tpu.dot_dimension_numbers<[1], [0], [0], [1], [0, 0, 1, 1], [], []>} : vector<8x256xf32>, vector<256x64xf32>, vector<8x64xf32> -> vector<8x64xf32>
    %c1_56 = arith.constant 1 : index
    %c0_57 = arith.constant 0 : index
    %c0_58 = arith.constant 0 : index
    %359 = vector.load %arg10[%c1_56, %c0_57, %c0_58] : memref<2x8x64xf32, #tpu.memory_space<vmem>>, vector<1x8x64xf32>
    %360 = vector.shape_cast %359 : vector<1x8x64xf32> to vector<8x64xf32>
    %361 = vector.shape_cast %358 : vector<8x64xf32> to vector<1x8x64xf32>
    tpu.vector_store %arg10[%c1_56, %c0_57, %c0_58], %361 {strides = array<i32>} : memref<2x8x64xf32, #tpu.memory_space<vmem>>, vector<1x8x64xf32>,
    return
  }
}

</mosaic_0001>

<bundles_post_ra>
// kernel: down_block_v4_forward.1
= control target key start
LH: loop header
LB: loop body
LE: loop exit
PB: predicated region body
PF: predicated region fallthrough
CT: control target
= control target key end

     0   :  { %v1410_v2 = vmov 0   ;;  %s1411_s17 = smov 127   ;;  %s1413_s18 = smov 16   ;;  %v52_v9 = vlaneseq  ;;  %vm87_vm2 = vcmask 1039360   ;;  %vm46_vm5 = vcmask 7168   ;;  %s2013_s0 = inlined_call_operand.vmem [shape: f32[2,4,256], index: 0, kind: input, shape index: {}]   ;;  %s2014_s7 = inlined_call_operand.vmem [shape: s32[1,256], index: 7, kind: input, shape index: {}]   ;;  %s2015_s1 = inlined_call_operand.vmem [shape: f32[8,36], index: 1, kind: input, shape index: {}]   ;;  %s2016_s2 = inlined_call_operand.vmem [shape: f32[8,1], index: 2, kind: input, shape index: {}]   ;;  %s2017_s3 = inlined_call_operand.vmem [shape: f32[8,1], index: 3, kind: input, shape index: {}]   ;;  %s2018_s4 = inlined_call_operand.vmem [shape: f32[8,72], index: 4, kind: input, shape index: {}]   ;;  %s2019_s5 = inlined_call_operand.vmem [shape: f32[8,1], index: 5, kind: input, shape index: {}]   ;;  %s2020_s6 = inlined_call_operand.vmem [shape: f32[8,1], index: 6, kind: input, shape index: {}]   ;;  %s2021_s9 = inlined_call_operand.vmem [shape: f32[2,8,256], index: 9, kind: output, shape index: {0}]   ;;  %s2022_s8 = inlined_call_operand.vmem [shape: f32[256,64], index: 8, kind: input, shape index: {}]   ;;  %s2023_s10 = inlined_call_operand.vmem [shape: f32[2,8,64], index: 10, kind: output, shape index: {1}]  }
   0x1   :  { %v1474_v0 = vld [vmem:[%s2013_s0] sm:$0xff]  ;;  %v1479_v1 = vld [vmem:[%s2013_s0 + $0x8] sm:$0xff]  ;;  %1322 = vset.pattern.permute.xlu1 %v1410_v2  ;;  %1323 = vset.pattern.permute.xlu0 %v1410_v2  ;;  %s1412_s0 = smov 1   ;;  %s1414_s19 = smov 112   ;;  %v1415_v52 = vmov 0.0   ;;  %vm156_vm8 = vcmask 1043456  }
   0x2   :  { %83 = vrot.lane.b32.xlu0 %v1474_v0, %s1411_s17  ;;  %v1485_v3 = vcombine.high %v1474_v0, %v1474_v0  ;;  %v1489_v4 = vcombine.high %v1479_v1, %v1479_v1  ;;  %v1287_v8 = vpack.i.bf16 %v1479_v1, %v1474_v0  ;;  %v34_v10 = vld [vmem:[%s2014_s7] sm:$0x3]  ;;  %v53_v11 = vshrl.u32 %v52_v9, 7  ;;  %238 = vmatprep.mubr.f32.mxu0 %v1415_v52 }
   0x3   :  { %vm36_vm0 = vcmp.eq.s32.totalorder %v34_v10, 15  ;;  %vm35_vm1 = vcmp.eq.s32.totalorder %v34_v10, 0  ;;  %414 = vmatprep.mubr.f32.mxu1 %v1415_v52  ;;  %vm71_vm9 = vcmask 130048   ;;  %vm119_vm10 = vcmask 916480  }
   0x4   :  { %85 = vrot.lane.b32.xlu1 %v1485_v3, %s1411_s17  ;;  %v1262_v5 = vpack.i.bf16 %v1485_v3, %v1474_v0  ;;  %v1267_v6 = vpack.i.bf16 %v1489_v4, %v1479_v1  ;;  %v1282_v7 = vpack.i.bf16 %v1489_v4, %v1485_v3  ;;  %v54_v12 = vsub.s32 0, %v53_v11 }
   0x5   :  { %v58_v13 = vsub.s32 1, %v53_v11  ;;  %v92_v14 = vsel %vm36_vm0, 1, %v1410_v2  ;;  %v51_v17 = vsel %vm35_vm1, 1, %v1410_v2  ;;  %vm165_vm11 = vcmask 293888  }
   0x6   :  { %1263 = vrot.lane.b32.xlu0 %v1262_v5, %s1412_s0  ;;  %v1514_v15 = vrot.slane %v92_v14, %v54_v12  ;;  %v1520_v19 = vrot.slane %v51_v17, %v54_v12  ;;  %vm550_vm12 = vcmask 588800   ;;  %vm947_vm13 = vcmask 523264  }
   0x7   :  { %v1516_v16 = vrot.slane %v92_v14, %v58_v13  ;;  %v1522_v20 = vrot.slane %v51_v17, %v58_v13 }
   0x8   :  { %1268 = vrot.lane.b32.xlu1 %v1267_v6, %s1412_s0  ;;  %vm101_vm3 = vcmp.eq.s32.totalorder %v1514_v15, 1  ;;  %vm60_vm6 = vcmp.eq.s32.totalorder %v1520_v19, 1 }
   0x9   :  { %vm102_vm4 = vcmp.eq.s32.totalorder %v1516_v16, 1  ;;  %vm61_vm7 = vcmp.eq.s32.totalorder %v1522_v20, 1 }
   0xa   :  { %277 = vrot.lane.b32.xlu0 %v1479_v1, %s1411_s17 }
   0xc   :  { %279 = vrot.lane.b32.xlu1 %v1489_v4, %s1411_s17 }
   0xe   :  { %1273 = vrot.lane.b32.xlu0 %v1262_v5, %s1413_s18 }
  0x10   :  { %1278 = vrot.lane.b32.xlu1 %v1267_v6, %s1413_s18 }
  0x12   :  { %1283 = vrot.lane.b32.xlu0 %v1282_v7, %s1414_s19 }
  0x14   :  { %1288 = vrot.lane.b32.xlu1 %v1287_v8, %s1414_s19 }
  0x74   :  { %v84_v18 = vpop.permute.xlu0 %83 }
  0x76   :  { %v86_v21 = vpop.permute.xlu1 %85 }
  0x77   :  { %v88_v22 = vsel %vm87_vm2, %v84_v18, %v86_v21  ;;  %v91_v23 = vsel %vm87_vm2, %v86_v21, %v1485_v3 }
  0x78   :  { %v1530_v24 = vsel %vm101_vm3, %v1474_v0, %v88_v22  ;;  %v1535_v25 = vsel %vm102_vm4, %v1485_v3, %v91_v23  ;;  %v1264_v26 = vpop.permute.xlu0 %1263 }
  0x79   :  { %v1266_v27 = vunpack.i.h.bf16 %v1264_v26  ;;  %v1265_v28 = vunpack.i.l.bf16 %v1264_v26  ;;  %v1297_v30 = vpack.i.bf16 %v1535_v25, %v1530_v24  ;;  %v148_v56 = vrot.slane %v1535_v25, 4 }
  0x7a   :  { %v1269_v29 = vpop.permute.xlu1 %1268  ;;  %v147_v63 = vrot.slane %v1530_v24, 4 }
  0x7b   :  { %v47_v31 = vsel %vm46_vm5, %v1265_v28, %v1266_v27  ;;  %v50_v32 = vsel %vm46_vm5, %v1474_v0, %v1265_v28  ;;  %v1271_v33 = vunpack.i.h.bf16 %v1269_v29  ;;  %v1270_v34 = vunpack.i.l.bf16 %v1269_v29  ;;  %1298 = vrot.lane.b32.xlu1 %v1297_v30, %s1413_s18 }
  0x7c   :  { %v278_v35 = vpop.permute.xlu0 %277  ;;  %v1548_v36 = vsel %vm60_vm6, %v1474_v0, %v50_v32  ;;  %v1553_v37 = vsel %vm61_vm7, %v1485_v3, %v47_v31  ;;  %v1611_v6 = vsel %vm156_vm8, %v1485_v3, %v148_v56 }
  0x7d   :  { %v253_v38 = vsel %vm46_vm5, %v1270_v34, %v1271_v33  ;;  %v256_v39 = vsel %vm46_vm5, %v1479_v1, %v1270_v34  ;;  %v1292_v40 = vpack.i.bf16 %v1553_v37, %v1548_v36  ;;  %v144_v10 = vrot.slane %v1553_v37, 4 }
  0x7e   :  { %v280_v41 = vpop.permute.xlu1 %279  ;;  %v1563_v42 = vsel %vm60_vm6, %v1479_v1, %v256_v39  ;;  %v1568_v43 = vsel %vm61_vm7, %v1489_v4, %v253_v38  ;;  %v143_v11 = vrot.slane %v1548_v36, 4 }
  0x7f   :  { %v284_v44 = vsel %vm87_vm2, %v280_v41, %v1489_v4  ;;  %v281_v45 = vsel %vm87_vm2, %v278_v35, %v280_v41  ;;  %1293 = vrot.lane.b32.xlu0 %v1292_v40, %s1413_s18  ;;  %v1302_v49 = vpack.i.bf16 %v1568_v43, %v1563_v42  ;;  %v1312_v50 = vpack.i.bf16 %v1563_v42, %v1548_v36 }
  0x80   :  { %v1577_v46 = vsel %vm102_vm4, %v1489_v4, %v284_v44  ;;  %v1582_v47 = vsel %vm101_vm3, %v1479_v1, %v281_v45  ;;  %v1317_v51 = vpack.i.bf16 %v1568_v43, %v1553_v37  ;;  %v1274_v54 = vpop.permute.xlu0 %1273  ;;  %v325_v17 = vrot.slane %v1568_v43, 4 }
  0x81   :  { %v1307_v48 = vpack.i.bf16 %v1577_v46, %v1582_v47  ;;  %v1275_v59 = vunpack.i.l.bf16 %v1274_v54  ;;  %v329_v60 = vrot.slane %v1577_v46, 4  ;;  %v1276_v61 = vunpack.i.h.bf16 %v1274_v54 }
  0x82   :  { %v1279_v53 = vpop.permute.xlu1 %1278  ;;  %v328_v12 = vrot.slane %v1582_v47, 4  ;;  %v324_v22 = vrot.slane %v1563_v42, 4 }
  0x83   :  { %1308 = vrot.lane.b32.xlu1 %v1307_v48, %s1413_s18  ;;  %1303 = vrot.lane.b32.xlu0 %v1302_v49, %s1413_s18  ;;  %v1280_v58 = vunpack.i.l.bf16 %v1279_v53  ;;  %v1281_v2 = vunpack.i.h.bf16 %v1279_v53  ;;  %v82_v8 = vsel %vm71_vm9, %v1474_v0, %v1275_v59  ;;  %v80_v21 = vsel %vm71_vm9, %v1275_v59, %v1276_v61 }
  0x84   :  { %v1284_v57 = vpop.permute.xlu0 %1283  ;;  %v1629_v23 = vsel %vm156_vm8, %v1489_v4, %v329_v60  ;;  %v139_v27 = vrot.slane %v82_v8, 4  ;;  %v140_v39 = vrot.slane %v80_v21, 4 }
  0x85   :  { %v1286_v62 = vunpack.i.h.bf16 %v1284_v57  ;;  %v1285_v5 = vunpack.i.l.bf16 %v1284_v57  ;;  %v276_v7 = vsel %vm71_vm9, %v1479_v1, %v1280_v58  ;;  %v274_v30 = vsel %vm71_vm9, %v1280_v58, %v1281_v2 }
  0x86   :  { %v1289_v55 = vpop.permute.xlu1 %1288  ;;  %v320_v26 = vrot.slane %v276_v7, 4  ;;  %v321_v44 = vrot.slane %v274_v30, 4 }
  0x87   :  { %1313 = vrot.lane.b32.xlu1 %v1312_v50, %s1414_s19  ;;  %1318 = vrot.lane.b32.xlu0 %v1317_v51, %s1414_s19  ;;  %v1623_v18 = vsel %vm119_vm10, %v1286_v62, %v1489_v4  ;;  %v130_v28 = vsel %vm119_vm10, %v1285_v5, %v1485_v3  ;;  %v1291_v35 = vunpack.i.h.bf16 %v1289_v55  ;;  %v1290_v38 = vunpack.i.l.bf16 %v1289_v55 }
  0x88   :  { %v334_v4 = vrot.slane %v1623_v18, 4  ;;  %v153_v40 = vrot.slane %v130_v28, 4 }
  0x89   :  { %v309_v58 = vsel %vm119_vm10, %v1291_v35, %v1286_v62  ;;  %v128_v59 = vsel %vm119_vm10, %v1290_v38, %v1285_v5 }
  0x8a   :  { %v152_v28 = vrot.slane %v128_v59, 4 }
  0x8b   :  { %314 = vrot.lane.b32.xlu1 %v1577_v46, %s1414_s19  ;;  %133 = vrot.lane.b32.xlu0 %v1535_v25, %s1414_s19 }
  0x8f   :  { %312 = vrot.lane.b32.xlu1 %v1582_v47, %s1414_s19  ;;  %131 = vrot.lane.b32.xlu0 %v1530_v24, %s1414_s19 }
  0xed   :  { %v1299_v9 = vpop.permute.xlu1 %1298 }
  0xee   :  { %v1301_v13 = vunpack.i.h.bf16 %v1299_v9  ;;  %v1300_v14 = vunpack.i.l.bf16 %v1299_v9 }
  0xf0   :  { %v111_v33 = vsel %vm71_vm9, %v1300_v14, %v1301_v13  ;;  %v114_v34 = vsel %vm71_vm9, %v1530_v24, %v1300_v14 }
  0xf1   :  { %v1294_v29 = vpop.permute.xlu0 %1293  ;;  %v160_v50 = vsel %vm156_vm8, %v111_v33, %v144_v10  ;;  %v159_v53 = vsel %vm156_vm8, %v114_v34, %v143_v11 }
  0xf2   :  { %v1296_v31 = vunpack.i.h.bf16 %v1294_v29  ;;  %v1295_v32 = vunpack.i.l.bf16 %v1294_v29 }
  0xf4   :  { %v72_v41 = vsel %vm71_vm9, %v1295_v32, %v1296_v31  ;;  %v75_v3 = vsel %vm71_vm9, %v1548_v36, %v1295_v32 }
  0xf5   :  { %v1309_v45 = vpop.permute.xlu1 %1308  ;;  %v1304_v48 = vpop.permute.xlu0 %1303  ;;  %v158_v49 = vsel %vm156_vm8, %v72_v41, %v140_v39  ;;  %v157_v51 = vsel %vm156_vm8, %v75_v3, %v139_v27 }
  0xf6   :  { %v1311_v54 = vunpack.i.h.bf16 %v1309_v45  ;;  %v1310_v55 = vunpack.i.l.bf16 %v1309_v45  ;;  %v1306_v56 = vunpack.i.h.bf16 %v1304_v48  ;;  %v1305_v57 = vunpack.i.l.bf16 %v1304_v48 }
  0xf7   :  { %v1144_v36 = vpack.c.bf16 %v160_v50, %v158_v49  ;;  %v1146_v60 = vpack.c.bf16 %v159_v53, %v157_v51 }
  0xf8   :  { %v266_v61 = vsel %vm71_vm9, %v1305_v57, %v1306_v56  ;;  %v293_v2 = vsel %vm71_vm9, %v1310_v55, %v1311_v54  ;;  %v269_v7 = vsel %vm71_vm9, %v1563_v42, %v1305_v57  ;;  %v296_v8 = vsel %vm71_vm9, %v1582_v47, %v1310_v55 }
  0xf9   :  { %1145 = vmatprep.subr.bf16.mxu0 %v1144_v36  ;;  %v1314_v9 = vpop.permute.xlu1 %1313  ;;  %v1319_v10 = vpop.permute.xlu0 %1318  ;;  %v338_v11 = vsel %vm156_vm8, %v266_v61, %v321_v44  ;;  %v340_v62 = vsel %vm156_vm8, %v293_v2, %v325_v17  ;;  %v337_v5 = vsel %vm156_vm8, %v269_v7, %v320_v26  ;;  %v339_v13 = vsel %vm156_vm8, %v296_v8, %v324_v22 }
  0xfa   :  { %v1316_v14 = vunpack.i.h.bf16 %v1314_v9  ;;  %v1315_v18 = vunpack.i.l.bf16 %v1314_v9  ;;  %v1321_v21 = vunpack.i.h.bf16 %v1319_v10  ;;  %v1320_v27 = vunpack.i.l.bf16 %v1319_v10  ;;  %1147 = vmatpush1.bf16.msra.mxu0 %v1146_v60 }
  0xfb   :  { %v333_v42 = vrot.slane %v309_v58, 4  ;;  %v1152_v29 = vpack.c.bf16 %v340_v62, %v338_v11  ;;  %v1154_v30 = vpack.c.bf16 %v339_v13, %v337_v5  ;;  %v447_v11 = vld [vmem:[%s2016_s2] sm:$0xff] }
  0xfc   :  { %v301_v31 = vsel %vm119_vm10, %v1316_v14, %v1321_v21  ;;  %v304_v32 = vsel %vm119_vm10, %v1321_v21, %v1568_v43  ;;  %v120_v17 = vsel %vm119_vm10, %v1315_v18, %v1320_v27  ;;  %v123_v26 = vsel %vm119_vm10, %v1320_v27, %v1553_v37  ;;  %v451_v13 = vld [vmem:[%s2017_s3] sm:$0xff] }
  0xfd   :  { %1153 = vmatprep.subr.bf16.mxu1 %v1152_v29  ;;  %v315_v22 = vpop.permute.xlu1 %314  ;;  %v134_v33 = vpop.permute.xlu0 %133  ;;  %v164_v34 = vsel %vm156_vm8, %v123_v26, %v153_v40  ;;  %v344_v35 = vsel %vm156_vm8, %v304_v32, %v334_v4  ;;  %v163_v38 = vsel %vm156_vm8, %v120_v17, %v152_v28  ;;  %v343_v39 = vsel %vm156_vm8, %v301_v31, %v333_v42 }
  0xfe   :  { %1155 = vmatpush1.bf16.msra.mxu1 %v1154_v30  ;;  %v1148_v41 = vpack.c.bf16 %v164_v34, %v1611_v6  ;;  %v1156_v43 = vpack.c.bf16 %v344_v35, %v1629_v23  ;;  %v161_v37 = vsel %vm156_vm8, %v1474_v0, %v147_v63  ;;  %v341_v40 = vsel %vm156_vm8, %v1479_v1, %v328_v12  ;;  %v37_v0 = vld [vmem:[%s2015_s1] sm:$0xff] }
  0xff   :  { %v1150_v4 = vpack.c.bf16 %v163_v38, %v161_v37  ;;  %v1158_v3 = vpack.c.bf16 %v343_v39, %v341_v40  ;;  %v137_v44 = vsel %vm119_vm10, %v134_v33, %v1535_v25  ;;  %v318_v24 = vsel %vm119_vm10, %v315_v22, %v1577_v46 }
 0x100   :  { %1149 = vmatprep.subr.bf16.mxu0 %v1148_v41  ;;  %1157 = vmatprep.subr.bf16.mxu1 %v1156_v43 }
 0x101   :  { %v132_v6 = vpop.permute.xlu0 %131  ;;  %1151 = vmatpush1.bf16.msra.mxu0 %v1150_v4  ;;  %v313_v23 = vpop.permute.xlu1 %312 }
 0x102   :  { %1159 = vmatpush1.bf16.msra.mxu1 %v1158_v3  ;;  %1062 = vmatprep.subr.msk.mxu0 %vm156_vm8, %v137_v44  ;;  %v135_v1 = vsel %vm119_vm10, %v132_v6, %v134_v33  ;;  %v316_v25 = vsel %vm119_vm10, %v313_v23, %v315_v22 }
 0x103   :  { %1066 = vmatprep.subr.msk.mxu1 %vm156_vm8, %v318_v24 }
 0x105   :  { %1063 = vmatpush1.msk.msra.mxu0 %vm156_vm8, %v135_v1 }
 0x106   :  { %1067 = vmatpush1.msk.msra.mxu1 %vm156_vm8, %v316_v25  ;;  %1064 = vmatmul.mubr.msk.f32.vlgmr.msra.gmra.mrb[0].mxu0 %vm165_vm11, %v37_v0 }
 0x107   :  { %1068 = vmatmul.mubr.msk.f32.vlgmr.msra.gmra.mrb[0].mxu1 %vm165_vm11, %v37_v0  ;;  %618 = vmatprep.mubr.f32.mxu0 %v1415_v52 }
 0x108   :  { %763 = vmatprep.mubr.f32.mxu1 %v1415_v52 }
 0x1d9   :  { %v240_v46 = vpop.f32.mrb[0].mxu0 }
 0x1da   :  { %v416_v47 = vpop.f32.mrb[0].mxu1  ;;  %v242_v63 = vpop.f32.mrb[1].mxu0 }
 0x1db   :  { %v418_v12 = vpop.f32.mrb[1].mxu1  ;;  %v421_v45 = vadd.f32 %v242_v63, %v240_v46 }
 0x1dc   :  { %v425_v48 = vadd.f32 %v418_v12, %v416_v47 }
 0x1dd   :  { %422 = vadd.xlane.f32.xlu0 %v421_v45 }
 0x1de   :  { %426 = vadd.xlane.f32.xlu1 %v425_v48 }
 0x26a   :  { %v423_v49 = vpop.xlane.xlu0 %422 }
 0x26b   :  { %v427_v50 = vpop.xlane.xlu1 %426 }
 0x26c   :  { %v428_v51 = vadd.f32 %v427_v50, %v423_v49 }
 0x26e   :  { %v429_v53 = vmul.f32 0.001953125, %v428_v51 }
 0x270   :  { %v430_v54 = vsub.f32 %v240_v46, %v429_v53  ;;  %v431_v55 = vsub.f32 %v242_v63, %v429_v53  ;;  %v438_v56 = vsub.f32 %v416_v47, %v429_v53  ;;  %v439_v57 = vsub.f32 %v418_v12, %v429_v53 }
 0x272   :  { %v432_v58 = vmul.f32 %v430_v54, %v430_v54  ;;  %v433_v59 = vmul.f32 %v431_v55, %v431_v55  ;;  %v440_v36 = vmul.f32 %v438_v56, %v438_v56  ;;  %v441_v52 = vmul.f32 %v439_v57, %v439_v57 }
 0x274   :  { %v434_v60 = vadd.f32 %v433_v59, %v432_v58  ;;  %v442_v61 = vadd.f32 %v441_v52, %v440_v36 }
 0x276   :  { %435 = vadd.xlane.f32.xlu0 %v434_v60 }
 0x27a   :  { %443 = vadd.xlane.f32.xlu0 %v442_v61 }
 0x303   :  { %v436_v2 = vpop.xlane.xlu0 %435 }
 0x307   :  { %v444_v7 = vpop.xlane.xlu0 %443 }
 0x308   :  { %v445_v8 = vadd.f32 %v444_v7, %v436_v2 }
 0x30a   :  { %v446_v9 = vmul.f32 0.001953125, %v445_v8 }
 0x30c   :  { %v448_v10 = vadd.f32 1e-05, %v446_v9 }
 0x30e   :  { %1406 = vrsqrt.f32 %v448_v10 }
 0x318   :  { %v1407_v62 = vpop.eup %1406 }
 0x319   :  { %v450_v5 = vmul.f32 %v1407_v62, %v447_v11 }
 0x31b   :  { %456 = vperm.xlu1 %1322, %v450_v5   ;;  %v452_v14 = vmul.f32 %v450_v5, %v429_v53 }
 0x31d   :  { %v453_v18 = vsub.f32 %v451_v13, %v452_v14 }
 0x31f   :  { %463 = vperm.xlu0 %1323, %v453_v18  }
 0x39a   :  { %v457_v21 = vpop.permute.xlu1 %456 }
 0x39b   :  { %v459_v27 = vmul.f32 %v457_v21, %v240_v46  ;;  %v460_v42 = vmul.f32 %v457_v21, %v242_v63  ;;  %v470_v28 = vmul.f32 %v457_v21, %v416_v47  ;;  %v471_v29 = vmul.f32 %v457_v21, %v418_v12 }
 0x39e   :  { %v464_v30 = vpop.permute.xlu0 %463 }
 0x39f   :  { %v466_v31 = vadd.f32 %v464_v30, %v459_v27  ;;  %v467_v32 = vadd.f32 %v464_v30, %v460_v42  ;;  %v472_v17 = vadd.f32 %v470_v28, %v464_v30  ;;  %v473_v26 = vadd.f32 %v471_v29, %v464_v30 }
 0x3a1   :  { %v1698_v22 = vmax.f32 %v466_v31, 0.0  ;;  %v1700_v33 = vmax.f32 %v467_v32, 0.0  ;;  %v1702_v34 = vmax.f32 %v472_v17, 0.0  ;;  %v1704_v35 = vmax.f32 %v473_v26, 0.0 }
 0x3a3   :  { %v1324_v38 = vpack.i.bf16 %v1700_v33, %v1698_v22  ;;  %v1329_v39 = vpack.i.bf16 %v1704_v35, %v1702_v34 }
 0x3a5   :  { %1325 = vrot.lane.b32.xlu1 %v1324_v38, %s1412_s0 }
 0x3a9   :  { %1330 = vrot.lane.b32.xlu1 %v1329_v39, %s1412_s0 }
 0x3ad   :  { %506 = vrot.lane.b32.xlu1 %v1698_v22, %s1411_s17 }
 0x3b1   :  { %508 = vrot.lane.b32.xlu1 %v1700_v33, %s1411_s17 }
 0x3b5   :  { %655 = vrot.lane.b32.xlu1 %v1702_v34, %s1411_s17 }
 0x3b9   :  { %657 = vrot.lane.b32.xlu1 %v1704_v35, %s1411_s17 }
 0x3bd   :  { %1335 = vrot.lane.b32.xlu1 %v1324_v38, %s1413_s18 }
 0x3c1   :  { %1340 = vrot.lane.b32.xlu1 %v1329_v39, %s1413_s18 }
 0x417   :  { %v1326_v41 = vpop.permute.xlu1 %1325 }
 0x418   :  { %v1328_v43 = vunpack.i.h.bf16 %v1326_v41  ;;  %v1327_v37 = vunpack.i.l.bf16 %v1326_v41 }
 0x41a   :  { %v482_v40 = vsel %vm46_vm5, %v1327_v37, %v1328_v43  ;;  %v485_v4 = vsel %vm46_vm5, %v1698_v22, %v1327_v37 }
 0x41b   :  { %v1331_v3 = vpop.permute.xlu1 %1330  ;;  %v1728_v44 = vsel %vm60_vm6, %v1698_v22, %v485_v4  ;;  %v1733_v6 = vsel %vm61_vm7, %v1700_v33, %v482_v40 }
 0x41c   :  { %v1333_v24 = vunpack.i.h.bf16 %v1331_v3  ;;  %v1332_v23 = vunpack.i.l.bf16 %v1331_v3  ;;  %v1344_v0 = vpack.i.bf16 %v1733_v6, %v1728_v44  ;;  %v1364_v53 = vpack.i.bf16 %v1700_v33, %v1733_v6 }
 0x41d   :  { %v1374_v36 = vpack.i.bf16 %v1698_v22, %v1728_v44 }
 0x41e   :  { %v631_v1 = vsel %vm46_vm5, %v1332_v23, %v1333_v24  ;;  %v634_v25 = vsel %vm46_vm5, %v1702_v34, %v1332_v23  ;;  %1345 = vrot.lane.b32.xlu1 %v1344_v0, %s1413_s18 }
 0x41f   :  { %v507_v46 = vpop.permute.xlu1 %506  ;;  %v1744_v47 = vsel %vm60_vm6, %v1702_v34, %v634_v25  ;;  %v1749_v63 = vsel %vm61_vm7, %v1704_v35, %v631_v1 }
 0x420   :  { %v1349_v12 = vpack.i.bf16 %v1749_v63, %v1744_v47  ;;  %v1369_v15 = vpack.i.bf16 %v1704_v35, %v1749_v63  ;;  %v1379_v16 = vpack.i.bf16 %v1702_v34, %v1744_v47 }
 0x422   :  { %1350 = vrot.lane.b32.xlu0 %v1349_v12, %s1413_s18 }
 0x423   :  { %v509_v45 = vpop.permute.xlu1 %508 }
 0x424   :  { %v510_v48 = vsel %vm87_vm2, %v507_v46, %v509_v45  ;;  %v513_v49 = vsel %vm87_vm2, %v509_v45, %v1700_v33 }
 0x425   :  { %v1760_v19 = vsel %vm101_vm3, %v1698_v22, %v510_v48  ;;  %v1765_v20 = vsel %vm102_vm4, %v1700_v33, %v513_v49 }
 0x426   :  { %v1354_v50 = vpack.i.bf16 %v1765_v20, %v1760_v19  ;;  %v1168_v0 = vpack.c.bf16 %v1765_v20, %v1700_v33 }
 0x427   :  { %v656_v51 = vpop.permute.xlu1 %655 }
 0x428   :  { %1355 = vrot.lane.b32.xlu0 %v1354_v50, %s1413_s18 }
 0x42b   :  { %v658_v54 = vpop.permute.xlu1 %657 }
 0x42c   :  { %v659_v55 = vsel %vm87_vm2, %v656_v51, %v658_v54  ;;  %v662_v56 = vsel %vm87_vm2, %v658_v54, %v1704_v35  ;;  %1365 = vrot.lane.b32.xlu0 %v1364_v53, %s1414_s19 }
 0x42d   :  { %v1779_v57 = vsel %vm101_vm3, %v1702_v34, %v659_v55  ;;  %v1784_v58 = vsel %vm102_vm4, %v1704_v35, %v662_v56 }
 0x42e   :  { %v1359_v59 = vpack.i.bf16 %v1784_v58, %v1779_v57 }
 0x42f   :  { %v1336_v52 = vpop.permute.xlu1 %1335 }
 0x430   :  { %1360 = vrot.lane.b32.xlu1 %v1359_v59, %s1413_s18  ;;  %1375 = vrot.lane.b32.xlu0 %v1374_v36, %s1414_s19  ;;  %v1338_v61 = vunpack.i.h.bf16 %v1336_v52  ;;  %v1337_v2 = vunpack.i.l.bf16 %v1336_v52 }
 0x432   :  { %v505_v10 = vsel %vm71_vm9, %v1698_v22, %v1337_v2  ;;  %v502_v11 = vsel %vm71_vm9, %v1337_v2, %v1338_v61 }
 0x433   :  { %v1341_v60 = vpop.permute.xlu1 %1340 }
 0x434   :  { %1370 = vrot.lane.b32.xlu1 %v1369_v15, %s1414_s19  ;;  %544 = vrot.lane.b32.xlu0 %v1765_v20, %s1414_s19  ;;  %v1343_v62 = vunpack.i.h.bf16 %v1341_v60  ;;  %v1342_v5 = vunpack.i.l.bf16 %v1341_v60 }
 0x436   :  { %v654_v29 = vsel %vm71_vm9, %v1702_v34, %v1342_v5  ;;  %v651_v32 = vsel %vm71_vm9, %v1342_v5, %v1343_v62 }
 0x438   :  { %1380 = vrot.lane.b32.xlu1 %v1379_v16, %s1414_s19  ;;  %542 = vrot.lane.b32.xlu0 %v1760_v19, %s1414_s19  ;;  %v1184_v16 = vpack.c.bf16 %v1784_v58, %v1704_v35 }
 0x43c   :  { %693 = vrot.lane.b32.xlu1 %v1784_v58, %s1414_s19 }
 0x440   :  { %691 = vrot.lane.b32.xlu1 %v1779_v57, %s1414_s19 }
 0x490   :  { %v1346_v7 = vpop.permute.xlu1 %1345 }
 0x491   :  { %v1348_v8 = vunpack.i.h.bf16 %v1346_v7  ;;  %v1347_v9 = vunpack.i.l.bf16 %v1346_v7  ;;  %v1186_v7 = vpack.c.bf16 %v1779_v57, %v1702_v34 }
 0x493   :  { %v497_v13 = vsel %vm71_vm9, %v1728_v44, %v1347_v9  ;;  %v494_v14 = vsel %vm71_vm9, %v1347_v9, %v1348_v8 }
 0x494   :  { %v1162_v18 = vpack.c.bf16 %v505_v10, %v497_v13  ;;  %v1351_v21 = vpop.permute.xlu0 %1350  ;;  %v1160_v27 = vpack.c.bf16 %v502_v11, %v494_v14 }
 0x495   :  { %v1353_v42 = vunpack.i.h.bf16 %v1351_v21  ;;  %v1352_v28 = vunpack.i.l.bf16 %v1351_v21 }
 0x496   :  { %1161 = vmatprep.subr.bf16.mxu0 %v1160_v27 }
 0x497   :  { %v646_v30 = vsel %vm71_vm9, %v1744_v47, %v1352_v28  ;;  %1163 = vmatpush1.bf16.msra.mxu0 %v1162_v18  ;;  %v643_v31 = vsel %vm71_vm9, %v1352_v28, %v1353_v42 }
 0x498   :  { %v1178_v17 = vpack.c.bf16 %v654_v29, %v646_v30  ;;  %v1176_v26 = vpack.c.bf16 %v651_v32, %v643_v31 }
 0x49a   :  { %v1356_v38 = vpop.permute.xlu0 %1355  ;;  %1177 = vmatprep.subr.bf16.mxu1 %v1176_v26 }
 0x49b   :  { %v1358_v39 = vunpack.i.h.bf16 %v1356_v38  ;;  %v1357_v41 = vunpack.i.l.bf16 %v1356_v38  ;;  %1179 = vmatpush1.bf16.msra.mxu1 %v1178_v17 }
 0x49d   :  { %v525_v43 = vsel %vm71_vm9, %v1760_v19, %v1357_v41  ;;  %v522_v37 = vsel %vm71_vm9, %v1357_v41, %v1358_v39 }
 0x49e   :  { %v1166_v40 = vpack.c.bf16 %v1728_v44, %v525_v43  ;;  %v1366_v4 = vpop.permute.xlu0 %1365  ;;  %v1164_v3 = vpack.c.bf16 %v1733_v6, %v522_v37  ;;  %v1170_v44 = vpack.c.bf16 %v1760_v19, %v1698_v22 }
 0x49f   :  { %v1368_v24 = vunpack.i.h.bf16 %v1366_v4  ;;  %v1367_v23 = vunpack.i.l.bf16 %v1366_v4 }
 0x4a0   :  { %1165 = vmatprep.subr.bf16.mxu0 %v1164_v3 }
 0x4a1   :  { %1167 = vmatpush1.bf16.msra.mxu0 %v1166_v40  ;;  %v533_v1 = vsel %vm119_vm10, %v1367_v23, %v1733_v6  ;;  %v541_v25 = vsel %vm119_vm10, %v1368_v24, %v1700_v33 }
 0x4a2   :  { %v1361_v46 = vpop.permute.xlu1 %1360  ;;  %v1376_v12 = vpop.permute.xlu0 %1375  ;;  %1169 = vmatprep.subr.bf16.mxu0 %v1168_v0  ;;  %v1172_v51 = vpack.c.bf16 %v541_v25, %v533_v1  ;;  %v796_v25 = vld [vmem:[%s2019_s5] sm:$0xff] }
 0x4a3   :  { %v1363_v45 = vunpack.i.h.bf16 %v1361_v46  ;;  %v1362_v48 = vunpack.i.l.bf16 %v1361_v46  ;;  %v1378_v49 = vunpack.i.h.bf16 %v1376_v12  ;;  %v1377_v50 = vunpack.i.l.bf16 %v1376_v12 }
 0x4a5   :  { %v674_v53 = vsel %vm71_vm9, %v1779_v57, %v1362_v48  ;;  %v530_v54 = vsel %vm119_vm10, %v1377_v50, %v1367_v23  ;;  %v538_v6 = vsel %vm119_vm10, %v1378_v49, %v1368_v24  ;;  %1171 = vmatpush1.bf16.msra.mxu0 %v1170_v44  ;;  %v671_v33 = vsel %vm71_vm9, %v1362_v48, %v1363_v45  ;;  %v800_v44 = vld [vmem:[%s2020_s6] sm:$0xff] }
 0x4a6   :  { %v1182_v55 = vpack.c.bf16 %v1744_v47, %v674_v53  ;;  %v1174_v56 = vpack.c.bf16 %v538_v6, %v530_v54  ;;  %v1371_v59 = vpop.permute.xlu1 %1370  ;;  %v545_v22 = vpop.permute.xlu0 %544  ;;  %1173 = vmatprep.subr.bf16.mxu0 %v1172_v51  ;;  %v1180_v19 = vpack.c.bf16 %v1749_v63, %v671_v33 }
 0x4a7   :  { %v1373_v36 = vunpack.i.h.bf16 %v1371_v59  ;;  %v1372_v15 = vunpack.i.l.bf16 %v1371_v59  ;;  %v549_v52 = vsel %vm119_vm10, %v545_v22, %v1765_v20  ;;  %v38_v20 = vld [vmem:[%s2018_s4] sm:$0xff] }
 0x4a8   :  { %1181 = vmatprep.subr.bf16.mxu1 %v1180_v19 }
 0x4a9   :  { %1175 = vmatpush1.bf16.msra.mxu0 %v1174_v56  ;;  %1183 = vmatpush1.bf16.msra.mxu1 %v1182_v55  ;;  %v682_v47 = vsel %vm119_vm10, %v1372_v15, %v1749_v63  ;;  %v690_v60 = vsel %vm119_vm10, %v1373_v36, %v1704_v35 }
 0x4aa   :  { %v1381_v61 = vpop.permute.xlu1 %1380  ;;  %v543_v2 = vpop.permute.xlu0 %542  ;;  %570 = vmatprep.subr.mxu0 %v549_v52  ;;  %1185 = vmatprep.subr.bf16.mxu1 %v1184_v16  ;;  %v1188_v63 = vpack.c.bf16 %v690_v60, %v682_v47  ;;  %v819_v52 = vld [vmem:[%s2022_s8 + $0x80] sm:$0xff]  ;;  %v820_v47 = vld [vmem:[%s2022_s8 + $0x88] sm:$0xff] }
 0x4ab   :  { %v1383_v8 = vunpack.i.h.bf16 %v1381_v61  ;;  %v1382_v9 = vunpack.i.l.bf16 %v1381_v61  ;;  %v546_v10 = vsel %vm119_vm10, %v543_v2, %v545_v22  ;;  %v803_v60 = vld [vmem:[%s2022_s8] sm:$0xff]  ;;  %v1192_v61 = vpack.c.bf16 %v820_v47, %v819_v52  ;;  %v804_v2 = vld [vmem:[%s2022_s8 + $0x8] sm:$0xff] }
 0x4ad   :  { %v679_v11 = vsel %vm119_vm10, %v1382_v9, %v1372_v15  ;;  %v687_v35 = vsel %vm119_vm10, %v1383_v8, %v1373_v36  ;;  %571 = vmatpush1.msra.mxu0 %v546_v10  ;;  %1187 = vmatpush1.bf16.msra.mxu1 %v1186_v7  ;;  %v821_v7 = vld [vmem:[%s2022_s8 + $0x90] sm:$0xff]  ;;  %v822_v8 = vld [vmem:[%s2022_s8 + $0x98] sm:$0xff]  ;;  %v1194_v9 = vpack.c.bf16 %v804_v2, %v803_v60 }
 0x4ae   :  { %v1190_v62 = vpack.c.bf16 %v687_v35, %v679_v11  ;;  %v694_v5 = vpop.permute.xlu1 %693  ;;  %1189 = vmatprep.subr.bf16.mxu1 %v1188_v63  ;;  %1069 = vmatmul.mubr.msk.f32.vlgmr.msra.gmra.mrb[2].mxu0 %vm550_vm12, %v38_v20  ;;  %v1196_v10 = vpack.c.bf16 %v822_v8, %v821_v7  ;;  %v806_v63 = vld [vmem:[%s2022_s8 + $0x18] sm:$0xff]  ;;  %v823_v11 = vld [vmem:[%s2022_s8 + $0xa0] sm:$0xff] }
 0x4af   :  { %v698_v34 = vsel %vm119_vm10, %v694_v5, %v1784_v58  ;;  %1193 = vmatprep.subr.bf16.mxu0 %v1192_v61 }
 0x4b0   :  { %1195 = vmatpush3.bf16.msra.mxu0 %v1194_v9 }
 0x4b1   :  { %1191 = vmatpush1.bf16.msra.mxu1 %v1190_v62  ;;  %v824_v62 = vld [vmem:[%s2022_s8 + $0xa8] sm:$0xff]  ;;  %1197 = vmatprep.subr.bf16.mxu0 %v1196_v10 }
 0x4b2   :  { %v692_v57 = vpop.permute.xlu1 %691  ;;  %715 = vmatprep.subr.mxu1 %v698_v34  ;;  %v1200_v34 = vpack.c.bf16 %v824_v62, %v823_v11 }
 0x4b3   :  { %v695_v13 = vsel %vm119_vm10, %v692_v57, %v694_v5  ;;  %v807_v57 = vld [vmem:[%s2022_s8 + $0x20] sm:$0xff] }
 0x4b5   :  { %716 = vmatpush1.msra.mxu1 %v695_v13  ;;  %v808_v13 = vld [vmem:[%s2022_s8 + $0x28] sm:$0xff] }
 0x4b6   :  { %1070 = vmatmul.mubr.msk.f32.vlgmr.msra.gmra.mrb[2].mxu1 %vm550_vm12, %v38_v20  ;;  %v805_v20 = vld [vmem:[%s2022_s8 + $0x10] sm:$0xff]  ;;  %1225 = vmatprep.subr.bf16.mxu1 %v1192_v61 }
 0x4b7   :  { %1227 = vmatpush3.bf16.msra.mxu1 %v1194_v9  ;;  %v1198_v5 = vpack.c.bf16 %v806_v63, %v805_v20 }
 0x4b8   :  { %1229 = vmatprep.subr.bf16.mxu1 %v1196_v10 }
 0x4b9   :  { %1199 = vmatpush3.bf16.msra.mxu0 %v1198_v5 }
 0x4ba   :  { %1201 = vmatprep.subr.bf16.mxu0 %v1200_v34 }
 0x4bb   :  { %1231 = vmatpush3.bf16.msra.mxu1 %v1198_v5 }
 0x4bc   :  { %1233 = vmatprep.subr.bf16.mxu1 %v1200_v34 }
 0x581   :  { %v620_v14 = vpop.f32.mrb[2].mxu0 }
 0x582   :  { %v622_v18 = vpop.f32.mrb[3].mxu0 }
 0x583   :  { %v770_v21 = vadd.f32 %v622_v18, %v620_v14 }
 0x585   :  { %771 = vadd.xlane.f32.xlu0 %v770_v21  ;;  %v1202_v21 = vpack.c.bf16 %v808_v13, %v807_v57 }
 0x587   :  { %1203 = vmatpush3.bf16.msra.mxu0 %v1202_v21  ;;  %1235 = vmatpush3.bf16.msra.mxu1 %v1202_v21 }
 0x589   :  { %v765_v27 = vpop.f32.mrb[2].mxu1 }
 0x58a   :  { %v767_v42 = vpop.f32.mrb[3].mxu1 }
 0x58b   :  { %v774_v28 = vadd.f32 %v767_v42, %v765_v27 }
 0x58d   :  { %775 = vadd.xlane.f32.xlu1 %v774_v28  ;;  %v810_v28 = vld [vmem:[%s2022_s8 + $0x38] sm:$0xff] }
 0x612   :  { %v772_v29 = vpop.xlane.xlu0 %771 }
 0x61a   :  { %v776_v30 = vpop.xlane.xlu1 %775 }
 0x61b   :  { %v777_v31 = vadd.f32 %v776_v30, %v772_v29  ;;  %v827_v29 = vld [vmem:[%s2022_s8 + $0xc0] sm:$0xff]  ;;  %v828_v30 = vld [vmem:[%s2022_s8 + $0xc8] sm:$0xff] }
 0x61d   :  { %v778_v32 = vmul.f32 0.001953125, %v777_v31 }
 0x61f   :  { %v779_v58 = vsub.f32 %v620_v14, %v778_v32  ;;  %v780_v17 = vsub.f32 %v622_v18, %v778_v32  ;;  %v787_v26 = vsub.f32 %v765_v27, %v778_v32  ;;  %v788_v38 = vsub.f32 %v767_v42, %v778_v32 }
 0x621   :  { %v781_v39 = vmul.f32 %v779_v58, %v779_v58  ;;  %v782_v41 = vmul.f32 %v780_v17, %v780_v17  ;;  %v789_v43 = vmul.f32 %v787_v26, %v787_v26  ;;  %v790_v37 = vmul.f32 %v788_v38, %v788_v38  ;;  %v811_v58 = vld [vmem:[%s2022_s8 + $0x40] sm:$0xff]  ;;  %v812_v17 = vld [vmem:[%s2022_s8 + $0x48] sm:$0xff]  ;;  %v829_v26 = vld [vmem:[%s2022_s8 + $0xd0] sm:$0xff] }
 0x622   :  { %v830_v38 = vld [vmem:[%s2022_s8 + $0xd8] sm:$0xff] }
 0x623   :  { %v783_v40 = vadd.f32 %v782_v41, %v781_v39  ;;  %v791_v4 = vadd.f32 %v790_v37, %v789_v43  ;;  %v1210_v39 = vpack.c.bf16 %v812_v17, %v811_v58  ;;  %v1212_v41 = vpack.c.bf16 %v830_v38, %v829_v26  ;;  %v813_v43 = vld [vmem:[%s2022_s8 + $0x50] sm:$0xff]  ;;  %v814_v37 = vld [vmem:[%s2022_s8 + $0x58] sm:$0xff] }
 0x625   :  { %784 = vadd.xlane.f32.xlu0 %v783_v40  ;;  %v1214_v40 = vpack.c.bf16 %v814_v37, %v813_v43 }
 0x629   :  { %792 = vadd.xlane.f32.xlu0 %v791_v4  ;;  %v831_v4 = vld [vmem:[%s2022_s8 + $0xe0] sm:$0xff] }
 0x6b2   :  { %v785_v3 = vpop.xlane.xlu0 %784 }
 0x6b6   :  { %v793_v24 = vpop.xlane.xlu0 %792 }
 0x6b7   :  { %v794_v23 = vadd.f32 %v793_v24, %v785_v3  ;;  %v832_v3 = vld [vmem:[%s2022_s8 + $0xe8] sm:$0xff]  ;;  %v815_v24 = vld [vmem:[%s2022_s8 + $0x60] sm:$0xff] }
 0x6b9   :  { %v795_v0 = vmul.f32 0.001953125, %v794_v23  ;;  %v1216_v23 = vpack.c.bf16 %v832_v3, %v831_v4 }
 0x6bb   :  { %v797_v1 = vadd.f32 1e-05, %v795_v0  ;;  %v816_v0 = vld [vmem:[%s2022_s8 + $0x68] sm:$0xff] }
 0x6bd   :  { %1408 = vrsqrt.f32 %v797_v1  ;;  %v1218_v1 = vpack.c.bf16 %v816_v0, %v815_v24 }
 0x6c7   :  { %v1409_v46 = vpop.eup %1408 }
 0x6c8   :  { %v799_v12 = vmul.f32 %v1409_v46, %v796_v25  ;;  %v833_v25 = vld [vmem:[%s2022_s8 + $0xf0] sm:$0xff]  ;;  %v834_v46 = vld [vmem:[%s2022_s8 + $0xf8] sm:$0xff] }
 0x6ca   :  { %837 = vperm.xlu1 %1322, %v799_v12   ;;  %v801_v45 = vmul.f32 %v799_v12, %v778_v32  ;;  %v1208_v32 = vpack.c.bf16 %v828_v30, %v827_v29 }
 0x6cc   :  { %v802_v48 = vsub.f32 %v800_v44, %v801_v45  ;;  %v1220_v44 = vpack.c.bf16 %v834_v46, %v833_v25  ;;  %v817_v45 = vld [vmem:[%s2022_s8 + $0x70] sm:$0xff] }
 0x6ce   :  { %844 = vperm.xlu0 %1323, %v802_v48   ;;  %v818_v48 = vld [vmem:[%s2022_s8 + $0x78] sm:$0xff] }
 0x749   :  { %v838_v49 = vpop.permute.xlu1 %837 }
 0x74a   :  { %v840_v50 = vmul.f32 %v838_v49, %v620_v14  ;;  %v841_v51 = vmul.f32 %v838_v49, %v622_v18  ;;  %v949_v53 = vmul.f32 %v838_v49, %v765_v27  ;;  %v950_v54 = vmul.f32 %v838_v49, %v767_v42  ;;  %v825_v14 = vld [vmem:[%s2022_s8 + $0xb0] sm:$0xff]  ;;  %v826_v18 = vld [vmem:[%s2022_s8 + $0xb8] sm:$0xff] }
 0x74b   :  { %v1204_v27 = vpack.c.bf16 %v826_v18, %v825_v14  ;;  %v809_v42 = vld [vmem:[%s2022_s8 + $0x30] sm:$0xff] }
 0x74c   :  { %v1206_v31 = vpack.c.bf16 %v810_v28, %v809_v42 }
 0x74d   :  { %v845_v6 = vpop.permute.xlu0 %844  ;;  %1205 = vmatprep.subr.bf16.mxu0 %v1204_v27  ;;  %1237 = vmatprep.subr.bf16.mxu1 %v1204_v27 }
 0x74e   :  { %v847_v33 = vadd.f32 %v845_v6, %v840_v50  ;;  %v848_v55 = vadd.f32 %v845_v6, %v841_v51  ;;  %v951_v56 = vadd.f32 %v949_v53, %v845_v6  ;;  %v952_v59 = vadd.f32 %v950_v54, %v845_v6  ;;  %1207 = vmatpush3.bf16.msra.mxu0 %v1206_v31 }
 0x74f   :  { %1239 = vmatpush3.bf16.msra.mxu1 %v1206_v31  ;;  %1209 = vmatprep.subr.bf16.mxu0 %v1208_v32  ;;  %v1222_v51 = vpack.c.bf16 %v818_v48, %v817_v45 }
 0x750   :  { %v1865_v22 = vmax.f32 %v847_v33, 0.0  ;;  %v1867_v19 = vmax.f32 %v848_v55, 0.0  ;;  %v1869_v36 = vmax.f32 %v951_v56, 0.0  ;;  %v1871_v15 = vmax.f32 %v952_v59, 0.0  ;;  %1241 = vmatprep.subr.bf16.mxu1 %v1208_v32 }
 0x752   :  { %851 = vst [vmem:[%s2021_s9] sm:$0xff] %v1865_v22  ;;  %852 = vst [vmem:[%s2021_s9 + $0x8] sm:$0xff] %v1867_v19  ;;  %v1384_v16 = vpack.i.bf16 %v1871_v15, %v1867_v19  ;;  %v1389_v35 = vpack.i.bf16 %v1869_v36, %v1865_v22  ;;  %1211 = vmatpush3.bf16.msra.mxu0 %v1210_v39 }
 0x753   :  { %1071 = vst [vmem:[%s2021_s9 + $0x10] sm:$0xff] %v1869_v36  ;;  %1072 = vst [vmem:[%s2021_s9 + $0x18] sm:$0xff] %v1871_v15  ;;  %1243 = vmatpush3.bf16.msra.mxu1 %v1210_v39  ;;  %1213 = vmatprep.subr.bf16.mxu0 %v1212_v41 }
 0x754   :  { %1385 = vrot.lane.b32.xlu1 %v1384_v16, %s1411_s17  ;;  %1245 = vmatprep.subr.bf16.mxu1 %v1212_v41 }
 0x756   :  { %1215 = vmatpush3.bf16.msra.mxu0 %v1214_v40 }
 0x757   :  { %1247 = vmatpush3.bf16.msra.mxu1 %v1214_v40  ;;  %1217 = vmatprep.subr.bf16.mxu0 %v1216_v23 }
 0x758   :  { %1390 = vrot.lane.b32.xlu1 %v1389_v35, %s1411_s17  ;;  %1249 = vmatprep.subr.bf16.mxu1 %v1216_v23 }
 0x75a   :  { %1219 = vmatpush3.bf16.msra.mxu0 %v1218_v1 }
 0x75b   :  { %1251 = vmatpush3.bf16.msra.mxu1 %v1218_v1  ;;  %1221 = vmatprep.subr.bf16.mxu0 %v1220_v44 }
 0x75c   :  { %1253 = vmatprep.subr.bf16.mxu1 %v1220_v44 }
 0x75e   :  { %1223 = vmatpush3.bf16.msra.mxu0 %v1222_v51 }
 0x75f   :  { %1255 = vmatpush3.bf16.msra.mxu1 %v1222_v51 }
 0x7c6   :  { %v1386_v12 = vpop.permute.xlu1 %1385 }
 0x7c7   :  { %v1388_v49 = vunpack.i.h.bf16 %v1386_v12  ;;  %v1387_v50 = vunpack.i.l.bf16 %v1386_v12 }
 0x7c9   :  { %v967_v53 = vsel %vm87_vm2, %v1388_v49, %v1871_v15  ;;  %v862_v54 = vsel %vm87_vm2, %v1387_v50, %v1867_v19 }
 0x7ca   :  { %v969_v6 = vmax.f32 %v1871_v15, %v967_v53  ;;  %v864_v33 = vmax.f32 %v1867_v19, %v862_v54  ;;  %v1391_v55 = vpop.permute.xlu1 %1390 }
 0x7cb   :  { %v1393_v56 = vunpack.i.h.bf16 %v1391_v55  ;;  %v1392_v59 = vunpack.i.l.bf16 %v1391_v55 }
 0x7cc   :  { %v1394_v16 = vpack.i.bf16 %v969_v6, %v864_v33 }
 0x7cd   :  { %v964_v52 = vsel %vm87_vm2, %v1393_v56, %v1388_v49  ;;  %v859_v47 = vsel %vm87_vm2, %v1392_v59, %v1387_v50 }
 0x7ce   :  { %1395 = vrot.lane.b32.xlu0 %v1394_v16, %s1414_s19  ;;  %v863_v60 = vmax.f32 %v1865_v22, %v859_v47  ;;  %v968_v61 = vmax.f32 %v1869_v36, %v964_v52 }
 0x7d0   :  { %v1399_v2 = vpack.i.bf16 %v968_v61, %v863_v60 }
 0x7d2   :  { %1400 = vrot.lane.b32.xlu1 %v1399_v2, %s1414_s19 }
 0x840   :  { %v1396_v15 = vpop.permute.xlu0 %1395 }
 0x841   :  { %v1398_v7 = vunpack.i.h.bf16 %v1396_v15  ;;  %v1397_v19 = vunpack.i.l.bf16 %v1396_v15 }
 0x843   :  { %v874_v8 = vsel %vm119_vm10, %v1397_v19, %v864_v33  ;;  %v979_v9 = vsel %vm119_vm10, %v1398_v7, %v969_v6 }
 0x844   :  { %v1401_v10 = vpop.permute.xlu1 %1400  ;;  %v876_v20 = vmax.f32 %v864_v33, %v874_v8  ;;  %v981_v63 = vmax.f32 %v969_v6, %v979_v9 }
 0x845   :  { %v1403_v11 = vunpack.i.h.bf16 %v1401_v10  ;;  %v1402_v35 = vunpack.i.l.bf16 %v1401_v10 }
 0x846   :  { %941 = vmatprep.mubr.f32.mxu0 %v876_v20  ;;  %1046 = vmatprep.mubr.f32.mxu1 %v981_v63 }
 0x847   :  { %v976_v22 = vsel %vm119_vm10, %v1403_v11, %v1398_v7  ;;  %v871_v36 = vsel %vm119_vm10, %v1402_v35, %v1397_v19 }
 0x848   :  { %v980_v62 = vmax.f32 %v968_v61, %v976_v22  ;;  %v875_v5 = vmax.f32 %v863_v60, %v871_v36 }
 0x84a   :  { %942 = vmatmul.mubr.f32.vlgmr.msra.gmra.mrb[4].mxu0 %v875_v5  ;;  %1047 = vmatmul.mubr.f32.vlgmr.msra.gmra.mrb[4].mxu1 %v980_v62 }
 0x91d   :  { %v1106_v34 = vpop.f32.mrb[4].mxu0  ;;  %v1141_v57 = vpop.f32.mrb[4].mxu1 }
 0x91e   :  { %v1107_v13 = vpop.f32.mrb[5].mxu0  ;;  %v1142_v14 = vpop.f32.mrb[5].mxu1 }
 0x91f   :  { %v1108_v18 = vadd.f32 %v1107_v13, %v1106_v34  ;;  %v1143_v21 = vadd.f32 %v1142_v14, %v1141_v57 }
 0x921   :  { %948 = vst.msk [vmem:[%s2023_s10] sm:$0xff] %vm947_vm13, %v1108_v18  ;;  %1073 = vst.msk [vmem:[%s2023_s10 + $0x8] sm:$0xff] %vm947_vm13, %v1143_v21 }

</bundles_post_ra>
